<compile_context>
chip_gen: v7x
topology: tpu7x:2x2x1
jax: 0.10.0
libtpu: 0.0.40
codegen_flags: <defaults>
</compile_context>

<pallas_src>
import functools
import math

import jax
import jax.numpy as jnp
from jax.experimental import pallas as pl
from jax.experimental.pallas import tpu as pltpu


def _tblock_kernel(*refs, n_heads, n_kv_heads, head_dim, eps, res_mult,
                   use_bf16, has_mask):
    f32 = jnp.float32
    md = jnp.bfloat16 if use_bf16 else jnp.float32      # MXU operand dtype
    H, NKV, HD = n_heads, n_kv_heads, head_dim
    HD2 = HD // 2
    n_rep = H // NKV

    if has_mask:
        (x_ref, mask_ref, cos_ref, sin_ref, anw_ref, fnw_ref,
         wq_ref, wk_ref, wv_ref, wo_ref, w1_ref, w2_ref, w3_ref,
         out_ref, qrot_sc, krot_sc, y_sc, hres_sc, hn_sc, acc_sc) = refs
    else:
        mask_ref = None
        (x_ref, cos_ref, sin_ref, anw_ref, fnw_ref,
         wq_ref, wk_ref, wv_ref, wo_ref, w1_ref, w2_ref, w3_ref,
         out_ref, qrot_sc, krot_sc, y_sc, hres_sc, hn_sc, acc_sc) = refs

    S = x_ref.shape[0]
    tile_s = out_ref.shape[0]
    j = pl.program_id(2)                                 # hidden (reduction) axis
    row0 = pl.multiple_of(pl.program_id(1) * tile_s, tile_s)

    def mm(a, b):                                        # MXU matmul, f32 accumulate
        return jnp.dot(a.astype(md), b.astype(md), preferred_element_type=f32)

    def mm_t(a, b):                                      # a @ b.T (contract last dims)
        return jax.lax.dot_general(a.astype(md), b.astype(md),
                                   (((1,), (1,)), ((), ())),
                                   preferred_element_type=f32)

    def rmsnorm(v, w):                                   # f32 elementwise (v5e-safe)
        return v * jax.lax.rsqrt(jnp.mean(v * v, axis=-1, keepdims=True) + eps) * w

    # ---- attention + residual: runs once per (batch, query-tile), at j == 0 ----
    @pl.when(j == 0)
    def _attention():
        x_full = x_ref[...]                              # (S, D): k/v need all rows
        x_q = x_ref[pl.ds(row0, tile_s), :]              # (tile_s, D): query rows
        anw = anw_ref[...]
        xn_full = rmsnorm(x_full, anw)
        xn_q = rmsnorm(x_q, anw)

        # projections (attention scale pre-folded into wq on the host)
        q = mm(xn_q, wq_ref[...])                        # (tile_s, H*HD)  [A|B] layout
        k = mm(xn_full, wk_ref[...])                     # (S, NKV*HD)     [A|B] layout
        v = mm(xn_full, wv_ref[...])                     # (S, NKV*HD)     original layout

        # RoPE once on the full slabs: wq/wk columns were de-interleaved on the
        # host to [all even dims | all odd dims], so rotary is pure fma with
        # host-pre-tiled cos/sin (no per-head broadcasts, no rotation matmul).
        cos_q = cos_ref[pl.ds(row0, tile_s), :]          # (tile_s, H*HD/2)
        sin_q = sin_ref[pl.ds(row0, tile_s), :]
        cos_k = cos_ref[:, :NKV * HD2]                   # (S, NKV*HD/2)
        sin_k = sin_ref[:, :NKV * HD2]

        hq = H * HD2
        qa, qb = q[:, :hq], q[:, hq:]
        qa_r = qa * cos_q - qb * sin_q
        qb_r = qb * cos_q + qa * sin_q
        hk = NKV * HD2
        ka, kb = k[:, :hk], k[:, hk:]
        ka_r = ka * cos_k - kb * sin_k
        kb_r = kb * cos_k + ka * sin_k

        # Reassemble head-contiguous rotated slabs (VMEM scratch) so each head's
        # q.k is ONE full-K (K = head_dim) MXU dot.  q.k dots are invariant to
        # the shared per-head column permutation; v and wo are untouched.
        for h in range(H):
            qrot_sc[:, h * HD:h * HD + HD2] = qa_r[:, h * HD2:(h + 1) * HD2]
            qrot_sc[:, h * HD + HD2:(h + 1) * HD] = qb_r[:, h * HD2:(h + 1) * HD2]
        for g in range(NKV):
            krot_sc[:, g * HD:g * HD + HD2] = ka_r[:, g * HD2:(g + 1) * HD2]
            krot_sc[:, g * HD + HD2:(g + 1) * HD] = kb_r[:, g * HD2:(g + 1) * HD2]

        # additive mask for this query tile
        if has_mask:
            mask_add = mask_ref[...]                     # (tile_s, S) external mask
        else:                                            # in-kernel causal mask
            rows = row0 + jax.lax.broadcasted_iota(jnp.int32, (tile_s, S), 0)
            cols = jax.lax.broadcasted_iota(jnp.int32, (tile_s, S), 1)
            mask_add = jnp.where(rows >= cols, 0.0, -1e30).astype(f32)

        # NOTE: heads stay a short static loop at toy head counts; at production
        # head counts move heads to lax.fori_loop / a grid axis to bound vreg
        # live ranges.
        for g in range(NKV):
            k_h = krot_sc[:, g * HD:(g + 1) * HD]        # shared by n_rep q heads
            v_h = v[:, g * HD:(g + 1) * HD]
            for r in range(n_rep):
                h = g * n_rep + r                        # repeat_interleave mapping
                q_h = qrot_sc[:, h * HD:(h + 1) * HD]
                sc = mm_t(q_h, k_h) + mask_add           # (tile_s, S), f32
                m = jnp.max(sc, axis=-1, keepdims=True)
                p = jnp.exp(sc - m)
                l = jnp.sum(p, axis=-1, keepdims=True)
                # exact reciprocal (EUP slot); causal diagonal keeps l > 0
                p = p * pl.reciprocal(l, approx=False)
                y_sc[:, h * HD:(h + 1) * HD] = mm(p, v_h)

        # one lane-dense big-K wo matmul over the whole y slab
        attn = mm(y_sc[...], wo_ref[...])                # (tile_s, D)
        h_res = x_q + attn * res_mult
        hres_sc[...] = h_res
        hn_sc[...] = rmsnorm(h_res, fnw_ref[...])
        acc_sc[...] = jnp.zeros_like(acc_sc)

    # ---- SwiGLU feed-forward: hidden dim streamed over the reduction axis ----
    hn = hn_sc[...]
    g1 = mm(hn, w1_ref[...])                             # (tile_s, tile_h)
    g3 = mm(hn, w3_ref[...])
    silu = g1 * pl.reciprocal(1.0 + jnp.exp(-g1), approx=use_bf16)
    acc_sc[...] += mm(silu * g3, w2_ref[...])            # accumulate partial FFN

    @pl.when(j == pl.num_programs(2) - 1)
    def _finalize():
        out_ref[...] = (hres_sc[...] + acc_sc[...] * res_mult).astype(out_ref.dtype)


def prepare_params(params, *, n_heads, n_local_heads, head_dim,
                   attention_multiplier=None, use_bf16_matmul=True):
    """One-time host-side weight prep (hoisted out of the per-call path):
    wq/wk column de-interleave for swizzle-free in-kernel RoPE, attention scale
    folded into wq, MXU-operand dtype casts.  Linear weights in `params` are
    (in, out) (transposed nn.Linear weights); norm weights are (dim,)/(1, dim)."""
    f32 = jnp.float32
    wdt = jnp.bfloat16 if use_bf16_matmul else jnp.float32
    H, NKV, HD = n_heads, n_local_heads, head_dim
    scale = (attention_multiplier if attention_multiplier is not None
             else 1.0 / math.sqrt(HD))

    def deinterleave(nh):   # per-head cols -> [all even dims | all odd dims]
        ev = (jnp.arange(nh)[:, None] * HD + jnp.arange(0, HD, 2)[None, :]).reshape(-1)
        return jnp.concatenate([ev, ev + 1])

    return {
        'attn_norm_w': params['attn_norm_w'].reshape(1, -1).astype(f32),
        'ffn_norm_w': params['ffn_norm_w'].reshape(1, -1).astype(f32),
        'wq': (params['wq'] * scale)[:, deinterleave(H)].astype(wdt),
        'wk': params['wk'][:, deinterleave(NKV)].astype(wdt),
        'wv': params['wv'].astype(wdt),
        'wo': params['wo'].astype(wdt),
        'w1': params['w1'].astype(wdt),
        'w2': params['w2'].astype(wdt),
        'w3': params['w3'].astype(wdt),
    }


def _largest_tile(n, preferred, align):
    if n <= preferred:
        return n
    t = (preferred // align) * align
    while t >= align:
        if n % t == 0:
            return t
        t -= align
    return n


def _vmem_limit_bytes():
    # Per-generation scoped-VMEM limit: ~3/4 of physical capacity (v5e/v6e
    # 128 MiB -> 96 MiB, v7x 64 MiB -> 48 MiB), instead of a hardcoded 32 MiB.
    try:
        cap = int(pltpu.get_tpu_info().vmem_capacity_bytes)
    except Exception:
        cap = 64 * 1024 * 1024
    return int(min(cap * 3 // 4, 96 * 1024 * 1024))


def transformer_block(x, input_pos, freqs_cis, prepared, *, n_heads,
                      n_local_heads, head_dim, eps=1e-5,
                      residual_multiplier=1.0, mask=None,
                      tile_s=None, tile_h=None):
    """Fused TransformerBlock forward.  `prepared` comes from prepare_params().
    mask=None (preferred) generates the causal mask in-kernel; an explicit
    additive (S, S) mask is also accepted for parity with the PyTorch API."""
    # TODO(synk): Attention.kv_cache / input_pos decode path not implemented;
    # this matches the module before setup_cache() (self.kv_cache is None).
    del input_pos
    f32 = jnp.float32
    B, S, D = x.shape
    H, NKV, HD = n_heads, n_local_heads, head_dim
    assert H % NKV == 0 and HD % 2 == 0
    hidden = prepared['w1'].shape[1]
    use_bf16 = prepared['wq'].dtype == jnp.bfloat16

    # tile sizes: query-row tiles multiples of 8, hidden tiles multiples of 128
    # (production: pick 256-multiples for the v6e/v7x 256-deep MXU).
    if tile_s is None:
        tile_s = _largest_tile(S, 256, 8)
    if tile_h is None:
        tile_h = _largest_tile(hidden, 512, 128)
    assert S % tile_s == 0 and (tile_s % 8 == 0 or tile_s == S)
    assert hidden % tile_h == 0 and (tile_h % 128 == 0 or tile_h == hidden)

    # per-call activation-side prep (cheap): cos/sin tiled to the q slab width
    cos_t = jnp.tile(freqs_cis[..., 0].astype(f32), (1, H))    # (S, H*HD/2)
    sin_t = jnp.tile(freqs_cis[..., 1].astype(f32), (1, H))

    has_mask = mask is not None
    grid = (B, S // tile_s, hidden // tile_h)

    def const_spec(a):        # grid-invariant: VMEM-resident, single-buffered
        return pl.BlockSpec(a.shape, lambda b, s, j, _nd=a.ndim: (0,) * _nd,
                            pipeline_mode=pl.Buffered(1))

    inputs = [x.astype(f32)]
    in_specs = [pl.BlockSpec((None, S, D), lambda b, s, j: (b, 0, 0))]
    if has_mask:
        inputs.append(mask.astype(f32))
        in_specs.append(pl.BlockSpec((tile_s, S), lambda b, s, j: (s, 0)))
    const_inputs = [cos_t, sin_t,
                    prepared['attn_norm_w'], prepared['ffn_norm_w'],
                    prepared['wq'], prepared['wk'], prepared['wv'], prepared['wo']]
    inputs += const_inputs
    in_specs += [const_spec(a) for a in const_inputs]
    # FFN weights are streamed over the hidden reduction axis (double-buffered).
    inputs += [prepared['w1'], prepared['w2'], prepared['w3']]
    in_specs += [pl.BlockSpec((D, tile_h), lambda b, s, j: (0, j)),
                 pl.BlockSpec((tile_h, D), lambda b, s, j: (j, 0)),
                 pl.BlockSpec((D, tile_h), lambda b, s, j: (0, j))]

    kernel = functools.partial(
        _tblock_kernel, n_heads=H, n_kv_heads=NKV, head_dim=HD, eps=eps,
        res_mult=residual_multiplier, use_bf16=use_bf16, has_mask=has_mask)

    return pl.pallas_call(
        kernel,
        out_shape=jax.ShapeDtypeStruct((B, S, D), f32),
        grid=grid,
        in_specs=in_specs,
        out_specs=pl.BlockSpec((None, tile_s, D), lambda b, s, j: (b, s, 0)),
        scratch_shapes=[
            pltpu.VMEM((tile_s, H * HD), f32),     # head-contiguous rotated q
            pltpu.VMEM((S, NKV * HD), f32),        # head-contiguous rotated k
            pltpu.VMEM((tile_s, H * HD), f32),     # lane-dense per-head y slab
            pltpu.VMEM((tile_s, D), f32),          # attention residual h
            pltpu.VMEM((tile_s, D), f32),          # rmsnorm(h), reused across hidden tiles
            pltpu.VMEM((tile_s, D), f32),          # FFN output accumulator
        ],
        compiler_params=pltpu.CompilerParams(
            dimension_semantics=("parallel", "parallel", "arbitrary"),
            vmem_limit_bytes=_vmem_limit_bytes()),
    )(*inputs)


# ----------------------- pure-JAX reference (for checking) -----------------------
def _reference(x, freqs_cis, mask, params, *, n_heads, n_local_heads, head_dim,
               eps, scale, res_mult):
    B, S, D = x.shape

    def rmsnorm(v, w):
        return v * jax.lax.rsqrt(jnp.mean(v * v, -1, keepdims=True) + eps) * w

    def rope(t):  # (B, S, nh, hd), exactly apply_rotary_emb semantics
        ts = t.reshape(*t.shape[:-1], -1, 2)
        fc = freqs_cis.reshape(1, S, 1, head_dim // 2, 2)
        out = jnp.stack([ts[..., 0] * fc[..., 0] - ts[..., 1] * fc[..., 1],
                         ts[..., 1] * fc[..., 0] + ts[..., 0] * fc[..., 1]], -1)
        return out.reshape(*t.shape)

    xn = rmsnorm(x, params['attn_norm_w'][0])
    q = (xn @ params['wq']).reshape(B, S, n_heads, head_dim)
    k = (xn @ params['wk']).reshape(B, S, n_local_heads, head_dim)
    v = (xn @ params['wv']).reshape(B, S, n_local_heads, head_dim)
    q, k = rope(q), rope(k)
    q, k, v = (jnp.swapaxes(t, 1, 2) for t in (q, k, v))
    n_rep = n_heads // n_local_heads
    k = jnp.repeat(k, n_rep, axis=1)
    v = jnp.repeat(v, n_rep, axis=1)
    s = jnp.einsum('bhqd,bhkd->bhqk', q, k) * scale + mask
    p = jax.nn.softmax(s, axis=-1)
    y = jnp.einsum('bhqk,bhkd->bhqd', p, v)
    y = jnp.swapaxes(y, 1, 2).reshape(B, S, D)
    h = x + (y @ params['wo']) * res_mult
    hn = rmsnorm(h, params['ffn_norm_w'][0])
    ff = (jax.nn.silu(hn @ params['w1']) * (hn @ params['w3'])) @ params['w2']
    return h + ff * res_mult


if __name__ == "__main__":
    # small TransformerArgs-consistent config; shapes chosen so that BOTH the
    # query-tile grid axis (2 tiles of 8) and the hidden reduction grid axis
    # (2 tiles of 128) are exercised.
    B, S, D = 2, 16, 32
    n_heads, n_local_heads = 4, 2
    head_dim = D // n_heads                      # 8
    hidden_dim = 256
    eps = 1e-5
    rope_base = 10000.0
    residual_multiplier = 1.0

    key = jax.random.PRNGKey(0)
    ks = jax.random.split(key, 9)
    init = lambda k, shape: (0.02 * jax.random.normal(k, shape)).astype(jnp.float32)

    params = {
        # RMSNorm weights (PyTorch default init = ones), stored as (1, D)
        'attn_norm_w': jnp.ones((1, D), jnp.float32),
        'ffn_norm_w': jnp.ones((1, D), jnp.float32),
        # Linear weights, pre-transposed to (in, out)
        'wq': init(ks[0], (D, n_heads * head_dim)),
        'wk': init(ks[1], (D, n_local_heads * head_dim)),
        'wv': init(ks[2], (D, n_local_heads * head_dim)),
        'wo': init(ks[3], (n_heads * head_dim, D)),
        'w1': init(ks[4], (D, hidden_dim)),
        'w2': init(ks[5], (hidden_dim, D)),
        'w3': init(ks[6], (D, hidden_dim)),
    }

    x = jax.random.normal(ks[7], (B, S, D), jnp.float32)
    input_pos = jnp.arange(S, dtype=jnp.int32)

    # freqs_cis: (S, head_dim//2, 2) = [cos, sin]
    inv_freq = 1.0 / (rope_base ** (jnp.arange(0, head_dim, 2, dtype=jnp.float32)
                                    / head_dim))
    angles = jnp.outer(jnp.arange(S, dtype=jnp.float32), inv_freq)
    freqs_cis = jnp.stack([jnp.cos(angles), jnp.sin(angles)], axis=-1)

    # additive causal mask (0 where attended, large negative where masked)
    tri = jnp.tril(jnp.ones((S, S), dtype=bool))
    mask = jnp.where(tri, 0.0, -1e30).astype(jnp.float32)

    ref = _reference(x, freqs_cis, mask, params,
                     n_heads=n_heads, n_local_heads=n_local_heads,
                     head_dim=head_dim, eps=eps,
                     scale=1.0 / math.sqrt(head_dim),
                     res_mult=residual_multiplier)

    common = dict(n_heads=n_heads, n_local_heads=n_local_heads,
                  head_dim=head_dim, eps=eps,
                  residual_multiplier=residual_multiplier,
                  tile_s=8, tile_h=128)

    # --- f32 MXU operands, in-kernel causal mask: tight check ---
    prep_f32 = prepare_params(params, n_heads=n_heads,
                              n_local_heads=n_local_heads, head_dim=head_dim,
                              attention_multiplier=None, use_bf16_matmul=False)
    out = jax.block_until_ready(
        transformer_block(x, input_pos, freqs_cis, prep_f32, mask=None, **common))
    assert out.shape == (B, S, D)
    assert jnp.allclose(out, ref, atol=1e-4, rtol=1e-4), "f32 kernel mismatch"

    # --- f32 with an explicit additive mask (PyTorch-API parity path) ---
    out_m = jax.block_until_ready(
        transformer_block(x, input_pos, freqs_cis, prep_f32, mask=mask, **common))
    assert jnp.allclose(out_m, ref, atol=1e-4, rtol=1e-4), "explicit-mask mismatch"

    # --- bf16 MXU operands (default, f32 accumulate + f32 elementwise) ---
    prep_bf16 = prepare_params(params, n_heads=n_heads,
                               n_local_heads=n_local_heads, head_dim=head_dim,
                               attention_multiplier=None, use_bf16_matmul=True)
    out_bf16 = jax.block_until_ready(
        transformer_block(x, input_pos, freqs_cis, prep_bf16, mask=None, **common))
    assert out_bf16.shape == (B, S, D)
    assert jnp.allclose(out_bf16, ref, atol=2e-2, rtol=2e-2), "bf16 kernel mismatch"

    print("KERNEL_OK")
</pallas_src>

<mosaic_0001>
module attributes {stable_mosaic.version = 11 : i64} {
  func.func @_tblock_kernel(%arg0: i32, %arg1: i32, %arg2: i32, %arg3: memref<1x16x32xf32, #tpu.memory_space<vmem>>, %arg4: memref<16x16xf32, #tpu.memory_space<vmem>>, %arg5: memref<16x16xf32, #tpu.memory_space<vmem>>, %arg6: memref<1x32xf32, #tpu.memory_space<vmem>>, %arg7: memref<1x32xf32, #tpu.memory_space<vmem>>, %arg8: memref<32x32xf32, #tpu.memory_space<vmem>>, %arg9: memref<32x16xf32, #tpu.memory_space<vmem>>, %arg10: memref<32x16xf32, #tpu.memory_space<vmem>>, %arg11: memref<32x32xf32, #tpu.memory_space<vmem>>, %arg12: memref<32x128xf32, #tpu.memory_space<vmem>>, %arg13: memref<128x32xf32, #tpu.memory_space<vmem>>, %arg14: memref<32x128xf32, #tpu.memory_space<vmem>>, %arg15: memref<1x8x32xf32, #tpu.memory_space<vmem>>, %arg16: memref<8x32xf32, #tpu.memory_space<vmem>>, %arg17: memref<16x16xf32, #tpu.memory_space<vmem>>, %arg18: memref<8x32xf32, #tpu.memory_space<vmem>>, %arg19: memref<8x32xf32, #tpu.memory_space<vmem>>, %arg20: memref<8x32xf32, #tpu.memory_space<vmem>>, %arg21: memref<8x32xf32, #tpu.memory_space<vmem>>) attributes {dimension_semantics = [#tpu.dimension_semantics<parallel>, #tpu.dimension_semantics<parallel>, #tpu.dimension_semantics<arbitrary>], iteration_bounds = array<i64: 2, 2, 2>, scalar_prefetch = 0 : i64, scratch_operands = 6 : i64, tpu.core_type = #tpu.core_type<tc>, window_params = [{transform_indices = @transform_0, window_bounds = array<i64: 1, 16, 32>}, {pipeline_mode = #tpu.pipeline_mode<synchronous>, transform_indices = @transform_1, window_bounds = array<i64: 16, 16>}, {pipeline_mode = #tpu.pipeline_mode<synchronous>, transform_indices = @transform_2, window_bounds = array<i64: 16, 16>}, {pipeline_mode = #tpu.pipeline_mode<synchronous>, transform_indices = @transform_3, window_bounds = array<i64: 1, 32>}, {pipeline_mode = #tpu.pipeline_mode<synchronous>, transform_indices = @transform_4, window_bounds = array<i64: 1, 32>}, {pipeline_mode = #tpu.pipeline_mode<synchronous>, transform_indices = @transform_5, window_bounds = array<i64: 32, 32>}, {pipeline_mode = #tpu.pipeline_mode<synchronous>, transform_indices = @transform_6, window_bounds = array<i64: 32, 16>}, {pipeline_mode = #tpu.pipeline_mode<synchronous>, transform_indices = @transform_7, window_bounds = array<i64: 32, 16>}, {pipeline_mode = #tpu.pipeline_mode<synchronous>, transform_indices = @transform_8, window_bounds = array<i64: 32, 32>}, {transform_indices = @transform_9, window_bounds = array<i64: 32, 128>}, {transform_indices = @transform_10, window_bounds = array<i64: 128, 32>}, {transform_indices = @transform_11, window_bounds = array<i64: 32, 128>}, {transform_indices = @transform_12, window_bounds = array<i64: 1, 8, 32>}]} {
    %c8_i32 = arith.constant 8 : i32
    %0 = arith.muli %arg1, %c8_i32 : i32
    %1 = tpu.assume_multiple %0, 8 : i32
    %c0_i32 = arith.constant 0 : i32
    %2 = arith.cmpi eq, %arg2, %c0_i32 : i32
    %3 = arith.extui %2 : i1 to i32
    %c0_i32_0 = arith.constant 0 : i32
    %4 = arith.cmpi ne, %3, %c0_i32_0 : i32
    scf.if %4 {
      %c0_17 = arith.constant 0 : index
      %c0_18 = arith.constant 0 : index
      %c0_19 = arith.constant 0 : index
      %26 = vector.load %arg3[%c0_17, %c0_18, %c0_19] : memref<1x16x32xf32, #tpu.memory_space<vmem>>, vector<1x16x32xf32>
      %27 = vector.shape_cast %26 : vector<1x16x32xf32> to vector<16x32xf32>
      %c0_20 = arith.constant 0 : index
      %28 = arith.index_cast %1 : i32 to index
      %c0_21 = arith.constant 0 : index
      %29 = vector.load %arg3[%c0_20, %28, %c0_21] : memref<1x16x32xf32, #tpu.memory_space<vmem>>, vector<1x8x32xf32>
      %30 = vector.shape_cast %29 : vector<1x8x32xf32> to vector<8x32xf32>
      %c0_22 = arith.constant 0 : index
      %c0_23 = arith.constant 0 : index
      %31 = vector.load %arg6[%c0_22, %c0_23] : memref<1x32xf32, #tpu.memory_space<vmem>>, vector<1x32xf32>
      %32 = arith.mulf %27, %27 : vector<16x32xf32>
      %cst_24 = arith.constant dense<0.000000e+00> : vector<16xf32>
      %33 = vector.multi_reduction <add>, %32, %cst_24 [1] : vector<16x32xf32> to vector<16xf32>
      %34 = vector.shape_cast %33 : vector<16xf32> to vector<16x1xf32>
      %cst_25 = arith.constant 3.200000e+01 : f32
      %35 = vector.broadcast %cst_25 : f32 to vector<16x1xf32>
      %36 = arith.divf %34, %35 : vector<16x1xf32>
      %cst_26 = arith.constant 9.99999974E-6 : f32
      %37 = vector.broadcast %cst_26 : f32 to vector<16x1xf32>
      %38 = arith.addf %36, %37 : vector<16x1xf32>
      %39 = math.rsqrt %38 : vector<16x1xf32>
      %40 = vector.broadcast %39 : vector<16x1xf32> to vector<16x32xf32>
      %41 = arith.mulf %27, %40 : vector<16x32xf32>
      %42 = vector.broadcast %31 : vector<1x32xf32> to vector<16x32xf32>
      %43 = arith.mulf %41, %42 : vector<16x32xf32>
      %44 = arith.mulf %30, %30 : vector<8x32xf32>
      %cst_27 = arith.constant dense<0.000000e+00> : vector<8xf32>
      %45 = vector.multi_reduction <add>, %44, %cst_27 [1] : vector<8x32xf32> to vector<8xf32>
      %46 = vector.shape_cast %45 : vector<8xf32> to vector<8x1xf32>
      %cst_28 = arith.constant 3.200000e+01 : f32
      %47 = vector.broadcast %cst_28 : f32 to vector<8x1xf32>
      %48 = arith.divf %46, %47 : vector<8x1xf32>
      %cst_29 = arith.constant 9.99999974E-6 : f32
      %49 = vector.broadcast %cst_29 : f32 to vector<8x1xf32>
      %50 = arith.addf %48, %49 : vector<8x1xf32>
      %51 = math.rsqrt %50 : vector<8x1xf32>
      %52 = vector.broadcast %51 : vector<8x1xf32> to vector<8x32xf32>
      %53 = arith.mulf %30, %52 : vector<8x32xf32>
      %54 = vector.broadcast %31 : vector<1x32xf32> to vector<8x32xf32>
      %55 = arith.mulf %53, %54 : vector<8x32xf32>
      %c0_30 = arith.constant 0 : index
      %c0_31 = arith.constant 0 : index
      %56 = vector.load %arg8[%c0_30, %c0_31] : memref<32x32xf32, #tpu.memory_space<vmem>>, vector<32x32xf32>
      %cst_32 = arith.constant dense<0.000000e+00> : vector<8x32xf32>
      %57 = tpu.matmul %55, %56, %cst_32 {dimension_numbers = #tpu.dot_dimension_numbers<[1], [0], [0], [1], [0, 0, 1, 1], [], []>} : vector<8x32xf32>, vector<32x32xf32>, vector<8x32xf32> -> vector<8x32xf32>
      %c0_33 = arith.constant 0 : index
      %c0_34 = arith.constant 0 : index
      %58 = vector.load %arg9[%c0_33, %c0_34] : memref<32x16xf32, #tpu.memory_space<vmem>>, vector<32x16xf32>
      %cst_35 = arith.constant dense<0.000000e+00> : vector<16x16xf32>
      %59 = tpu.matmul %43, %58, %cst_35 {dimension_numbers = #tpu.dot_dimension_numbers<[1], [0], [0], [1], [0, 0, 1, 1], [], []>} : vector<16x32xf32>, vector<32x16xf32>, vector<16x16xf32> -> vector<16x16xf32>
      %c0_36 = arith.constant 0 : index
      %c0_37 = arith.constant 0 : index
      %60 = vector.load %arg10[%c0_36, %c0_37] : memref<32x16xf32, #tpu.memory_space<vmem>>, vector<32x16xf32>
      %cst_38 = arith.constant dense<0.000000e+00> : vector<16x16xf32>
      %61 = tpu.matmul %43, %60, %cst_38 {dimension_numbers = #tpu.dot_dimension_numbers<[1], [0], [0], [1], [0, 0, 1, 1], [], []>} : vector<16x32xf32>, vector<32x16xf32>, vector<16x16xf32> -> vector<16x16xf32>
      %62 = arith.index_cast %1 : i32 to index
      %c0_39 = arith.constant 0 : index
      %63 = vector.load %arg4[%62, %c0_39] : memref<16x16xf32, #tpu.memory_space<vmem>>, vector<8x16xf32>
      %64 = arith.index_cast %1 : i32 to index
      %c0_40 = arith.constant 0 : index
      %65 = vector.load %arg5[%64, %c0_40] : memref<16x16xf32, #tpu.memory_space<vmem>>, vector<8x16xf32>
      %c0_41 = arith.constant 0 : index
      %c0_42 = arith.constant 0 : index
      %66 = vector.load %arg4[%c0_41, %c0_42] : memref<16x16xf32, #tpu.memory_space<vmem>>, vector<16x8xf32>
      %c0_43 = arith.constant 0 : index
      %c0_44 = arith.constant 0 : index
      %67 = vector.load %arg5[%c0_43, %c0_44] : memref<16x16xf32, #tpu.memory_space<vmem>>, vector<16x8xf32>
      %68 = vector.extract_strided_slice %57 {offsets = [0, 0], sizes = [8, 16], strides = [1, 1]} : vector<8x32xf32> to vector<8x16xf32>
      %69 = vector.extract_strided_slice %57 {offsets = [0, 16], sizes = [8, 16], strides = [1, 1]} : vector<8x32xf32> to vector<8x16xf32>
      %70 = arith.mulf %68, %63 : vector<8x16xf32>
      %71 = arith.mulf %69, %65 : vector<8x16xf32>
      %72 = arith.subf %70, %71 : vector<8x16xf32>
      %73 = arith.mulf %69, %63 : vector<8x16xf32>
      %74 = arith.mulf %68, %65 : vector<8x16xf32>
      %75 = arith.addf %73, %74 : vector<8x16xf32>
      %76 = vector.extract_strided_slice %59 {offsets = [0, 0], sizes = [16, 8], strides = [1, 1]} : vector<16x16xf32> to vector<16x8xf32>
      %77 = vector.extract_strided_slice %59 {offsets = [0, 8], sizes = [16, 8], strides = [1, 1]} : vector<16x16xf32> to vector<16x8xf32>
      %78 = arith.mulf %76, %66 : vector<16x8xf32>
      %79 = arith.mulf %77, %67 : vector<16x8xf32>
      %80 = arith.subf %78, %79 : vector<16x8xf32>
      %81 = arith.mulf %77, %66 : vector<16x8xf32>
      %82 = arith.mulf %76, %67 : vector<16x8xf32>
      %83 = arith.addf %81, %82 : vector<16x8xf32>
      %84 = vector.extract_strided_slice %72 {offsets = [0, 0], sizes = [8, 4], strides = [1, 1]} : vector<8x16xf32> to vector<8x4xf32>
      %c0_45 = arith.constant 0 : index
      %c0_46 = arith.constant 0 : index
      %85 = vector.load %arg16[%c0_45, %c0_46] : memref<8x32xf32, #tpu.memory_space<vmem>>, vector<8x4xf32>
      tpu.vector_store %arg16[%c0_45, %c0_46], %84 {strides = array<i32>} : memref<8x32xf32, #tpu.memory_space<vmem>>, vector<8x4xf32>,
      %86 = vector.extract_strided_slice %75 {offsets = [0, 0], sizes = [8, 4], strides = [1, 1]} : vector<8x16xf32> to vector<8x4xf32>
      %c0_47 = arith.constant 0 : index
      %c4 = arith.constant 4 : index
      %87 = vector.load %arg16[%c0_47, %c4] : memref<8x32xf32, #tpu.memory_space<vmem>>, vector<8x4xf32>
      tpu.vector_store %arg16[%c0_47, %c4], %86 {strides = array<i32>} : memref<8x32xf32, #tpu.memory_space<vmem>>, vector<8x4xf32>,
      %88 = vector.extract_strided_slice %72 {offsets = [0, 4], sizes = [8, 4], strides = [1, 1]} : vector<8x16xf32> to vector<8x4xf32>
      %c0_48 = arith.constant 0 : index
      %c8 = arith.constant 8 : index
      %89 = vector.load %arg16[%c0_48, %c8] : memref<8x32xf32, #tpu.memory_space<vmem>>, vector<8x4xf32>
      tpu.vector_store %arg16[%c0_48, %c8], %88 {strides = array<i32>} : memref<8x32xf32, #tpu.memory_space<vmem>>, vector<8x4xf32>,
      %90 = vector.extract_strided_slice %75 {offsets = [0, 4], sizes = [8, 4], strides = [1, 1]} : vector<8x16xf32> to vector<8x4xf32>
      %c0_49 = arith.constant 0 : index
      %c12 = arith.constant 12 : index
      %91 = vector.load %arg16[%c0_49, %c12] : memref<8x32xf32, #tpu.memory_space<vmem>>, vector<8x4xf32>
      tpu.vector_store %arg16[%c0_49, %c12], %90 {strides = array<i32>} : memref<8x32xf32, #tpu.memory_space<vmem>>, vector<8x4xf32>,
      %92 = vector.extract_strided_slice %72 {offsets = [0, 8], sizes = [8, 4], strides = [1, 1]} : vector<8x16xf32> to vector<8x4xf32>
      %c0_50 = arith.constant 0 : index
      %c16 = arith.constant 16 : index
      %93 = vector.load %arg16[%c0_50, %c16] : memref<8x32xf32, #tpu.memory_space<vmem>>, vector<8x4xf32>
      tpu.vector_store %arg16[%c0_50, %c16], %92 {strides = array<i32>} : memref<8x32xf32, #tpu.memory_space<vmem>>, vector<8x4xf32>,
      %94 = vector.extract_strided_slice %75 {offsets = [0, 8], sizes = [8, 4], strides = [1, 1]} : vector<8x16xf32> to vector<8x4xf32>
      %c0_51 = arith.constant 0 : index
      %c20 = arith.constant 20 : index
      %95 = vector.load %arg16[%c0_51, %c20] : memref<8x32xf32, #tpu.memory_space<vmem>>, vector<8x4xf32>
      tpu.vector_store %arg16[%c0_51, %c20], %94 {strides = array<i32>} : memref<8x32xf32, #tpu.memory_space<vmem>>, vector<8x4xf32>,
      %96 = vector.extract_strided_slice %72 {offsets = [0, 12], sizes = [8, 4], strides = [1, 1]} : vector<8x16xf32> to vector<8x4xf32>
      %c0_52 = arith.constant 0 : index
      %c24 = arith.constant 24 : index
      %97 = vector.load %arg16[%c0_52, %c24] : memref<8x32xf32, #tpu.memory_space<vmem>>, vector<8x4xf32>
      tpu.vector_store %arg16[%c0_52, %c24], %96 {strides = array<i32>} : memref<8x32xf32, #tpu.memory_space<vmem>>, vector<8x4xf32>,
      %98 = vector.extract_strided_slice %75 {offsets = [0, 12], sizes = [8, 4], strides = [1, 1]} : vector<8x16xf32> to vector<8x4xf32>
      %c0_53 = arith.constant 0 : index
      %c28 = arith.constant 28 : index
      %99 = vector.load %arg16[%c0_53, %c28] : memref<8x32xf32, #tpu.memory_space<vmem>>, vector<8x4xf32>
      tpu.vector_store %arg16[%c0_53, %c28], %98 {strides = array<i32>} : memref<8x32xf32, #tpu.memory_space<vmem>>, vector<8x4xf32>,
      %100 = vector.extract_strided_slice %80 {offsets = [0, 0], sizes = [16, 4], strides = [1, 1]} : vector<16x8xf32> to vector<16x4xf32>
      %c0_54 = arith.constant 0 : index
      %c0_55 = arith.constant 0 : index
      %101 = vector.load %arg17[%c0_54, %c0_55] : memref<16x16xf32, #tpu.memory_space<vmem>>, vector<16x4xf32>
      tpu.vector_store %arg17[%c0_54, %c0_55], %100 {strides = array<i32>} : memref<16x16xf32, #tpu.memory_space<vmem>>, vector<16x4xf32>,
      %102 = vector.extract_strided_slice %83 {offsets = [0, 0], sizes = [16, 4], strides = [1, 1]} : vector<16x8xf32> to vector<16x4xf32>
      %c0_56 = arith.constant 0 : index
      %c4_57 = arith.constant 4 : index
      %103 = vector.load %arg17[%c0_56, %c4_57] : memref<16x16xf32, #tpu.memory_space<vmem>>, vector<16x4xf32>
      tpu.vector_store %arg17[%c0_56, %c4_57], %102 {strides = array<i32>} : memref<16x16xf32, #tpu.memory_space<vmem>>, vector<16x4xf32>,
      %104 = vector.extract_strided_slice %80 {offsets = [0, 4], sizes = [16, 4], strides = [1, 1]} : vector<16x8xf32> to vector<16x4xf32>
      %c0_58 = arith.constant 0 : index
      %c8_59 = arith.constant 8 : index
      %105 = vector.load %arg17[%c0_58, %c8_59] : memref<16x16xf32, #tpu.memory_space<vmem>>, vector<16x4xf32>
      tpu.vector_store %arg17[%c0_58, %c8_59], %104 {strides = array<i32>} : memref<16x16xf32, #tpu.memory_space<vmem>>, vector<16x4xf32>,
      %106 = vector.extract_strided_slice %83 {offsets = [0, 4], sizes = [16, 4], strides = [1, 1]} : vector<16x8xf32> to vector<16x4xf32>
      %c0_60 = arith.constant 0 : index
      %c12_61 = arith.constant 12 : index
      %107 = vector.load %arg17[%c0_60, %c12_61] : memref<16x16xf32, #tpu.memory_space<vmem>>, vector<16x4xf32>
      tpu.vector_store %arg17[%c0_60, %c12_61], %106 {strides = array<i32>} : memref<16x16xf32, #tpu.memory_space<vmem>>, vector<16x4xf32>,
      %108 = tpu.iota {dimensions = array<i32: 0>} : vector<8x16xi32>
      %109 = vector.broadcast %1 : i32 to vector<8x16xi32>
      %110 = arith.addi %109, %108 : vector<8x16xi32>
      %111 = tpu.iota {dimensions = array<i32: 1>} : vector<8x16xi32>
      %112 = arith.cmpi sge, %110, %111 : vector<8x16xi32>
      %cst_62 = arith.constant 0.000000e+00 : f32
      %cst_63 = arith.constant -1.000000e+30 : f32
      %113 = vector.broadcast %cst_62 : f32 to vector<8x16xf32>
      %114 = vector.broadcast %cst_63 : f32 to vector<8x16xf32>
      %115 = arith.select %112, %113, %114 : vector<8x16xi1>, vector<8x16xf32>
      %c0_64 = arith.constant 0 : index
      %c0_65 = arith.constant 0 : index
      %116 = vector.load %arg17[%c0_64, %c0_65] : memref<16x16xf32, #tpu.memory_space<vmem>>, vector<16x8xf32>
      %117 = vector.extract_strided_slice %61 {offsets = [0, 0], sizes = [16, 8], strides = [1, 1]} : vector<16x16xf32> to vector<16x8xf32>
      %c0_66 = arith.constant 0 : index
      %c0_67 = arith.constant 0 : index
      %118 = vector.load %arg16[%c0_66, %c0_67] : memref<8x32xf32, #tpu.memory_space<vmem>>, vector<8x8xf32>
      %cst_68 = arith.constant dense<0.000000e+00> : vector<8x16xf32>
      %119 = tpu.matmul %118, %116, %cst_68 {dimension_numbers = #tpu.dot_dimension_numbers<[1], [1], [0], [0], [0, 0, 1, 0], [], []>} : vector<8x8xf32>, vector<16x8xf32>, vector<8x16xf32> -> vector<8x16xf32>
      %120 = arith.addf %119, %115 : vector<8x16xf32>
      %cst_69 = arith.constant dense<0xFF800000> : vector<8xf32>
      %121 = vector.multi_reduction <maximumf>, %120, %cst_69 [1] : vector<8x16xf32> to vector<8xf32>
      %122 = vector.shape_cast %121 : vector<8xf32> to vector<8x1xf32>
      %123 = vector.broadcast %122 : vector<8x1xf32> to vector<8x16xf32>
      %124 = arith.subf %120, %123 : vector<8x16xf32>
      %125 = math.exp %124 : vector<8x16xf32>
      %cst_70 = arith.constant dense<0.000000e+00> : vector<8xf32>
      %126 = vector.multi_reduction <add>, %125, %cst_70 [1] : vector<8x16xf32> to vector<8xf32>
      %127 = vector.shape_cast %126 : vector<8xf32> to vector<8x1xf32>
      %128 = tpu.reciprocal %127 : vector<8x1xf32> -> vector<8x1xf32>
      %129 = vector.broadcast %128 : vector<8x1xf32> to vector<8x16xf32>
      %130 = arith.mulf %125, %129 : vector<8x16xf32>
      %cst_71 = arith.constant dense<0.000000e+00> : vector<8x8xf32>
      %131 = tpu.matmul %130, %117, %cst_71 {dimension_numbers = #tpu.dot_dimension_numbers<[1], [0], [0], [1], [0, 0, 1, 1], [], []>} : vector<8x16xf32>, vector<16x8xf32>, vector<8x8xf32> -> vector<8x8xf32>
      %c0_72 = arith.constant 0 : index
      %c0_73 = arith.constant 0 : index
      %132 = vector.load %arg18[%c0_72, %c0_73] : memref<8x32xf32, #tpu.memory_space<vmem>>, vector<8x8xf32>
      tpu.vector_store %arg18[%c0_72, %c0_73], %131 {strides = array<i32>} : memref<8x32xf32, #tpu.memory_space<vmem>>, vector<8x8xf32>,
      %c0_74 = arith.constant 0 : index
      %c8_75 = arith.constant 8 : index
      %133 = vector.load %arg16[%c0_74, %c8_75] : memref<8x32xf32, #tpu.memory_space<vmem>>, vector<8x8xf32>
      %cst_76 = arith.constant dense<0.000000e+00> : vector<8x16xf32>
      %134 = tpu.matmul %133, %116, %cst_76 {dimension_numbers = #tpu.dot_dimension_numbers<[1], [1], [0], [0], [0, 0, 1, 0], [], []>} : vector<8x8xf32>, vector<16x8xf32>, vector<8x16xf32> -> vector<8x16xf32>
      %135 = arith.addf %134, %115 : vector<8x16xf32>
      %cst_77 = arith.constant dense<0xFF800000> : vector<8xf32>
      %136 = vector.multi_reduction <maximumf>, %135, %cst_77 [1] : vector<8x16xf32> to vector<8xf32>
      %137 = vector.shape_cast %136 : vector<8xf32> to vector<8x1xf32>
      %138 = vector.broadcast %137 : vector<8x1xf32> to vector<8x16xf32>
      %139 = arith.subf %135, %138 : vector<8x16xf32>
      %140 = math.exp %139 : vector<8x16xf32>
      %cst_78 = arith.constant dense<0.000000e+00> : vector<8xf32>
      %141 = vector.multi_reduction <add>, %140, %cst_78 [1] : vector<8x16xf32> to vector<8xf32>
      %142 = vector.shape_cast %141 : vector<8xf32> to vector<8x1xf32>
      %143 = tpu.reciprocal %142 : vector<8x1xf32> -> vector<8x1xf32>
      %144 = vector.broadcast %143 : vector<8x1xf32> to vector<8x16xf32>
      %145 = arith.mulf %140, %144 : vector<8x16xf32>
      %cst_79 = arith.constant dense<0.000000e+00> : vector<8x8xf32>
      %146 = tpu.matmul %145, %117, %cst_79 {dimension_numbers = #tpu.dot_dimension_numbers<[1], [0], [0], [1], [0, 0, 1, 1], [], []>} : vector<8x16xf32>, vector<16x8xf32>, vector<8x8xf32> -> vector<8x8xf32>
      %c0_80 = arith.constant 0 : index
      %c8_81 = arith.constant 8 : index
      %147 = vector.load %arg18[%c0_80, %c8_81] : memref<8x32xf32, #tpu.memory_space<vmem>>, vector<8x8xf32>
      tpu.vector_store %arg18[%c0_80, %c8_81], %146 {strides = array<i32>} : memref<8x32xf32, #tpu.memory_space<vmem>>, vector<8x8xf32>,
      %c0_82 = arith.constant 0 : index
      %c8_83 = arith.constant 8 : index
      %148 = vector.load %arg17[%c0_82, %c8_83] : memref<16x16xf32, #tpu.memory_space<vmem>>, vector<16x8xf32>
      %149 = vector.extract_strided_slice %61 {offsets = [0, 8], sizes = [16, 8], strides = [1, 1]} : vector<16x16xf32> to vector<16x8xf32>
      %c0_84 = arith.constant 0 : index
      %c16_85 = arith.constant 16 : index
      %150 = vector.load %arg16[%c0_84, %c16_85] : memref<8x32xf32, #tpu.memory_space<vmem>>, vector<8x8xf32>
      %cst_86 = arith.constant dense<0.000000e+00> : vector<8x16xf32>
      %151 = tpu.matmul %150, %148, %cst_86 {dimension_numbers = #tpu.dot_dimension_numbers<[1], [1], [0], [0], [0, 0, 1, 0], [], []>} : vector<8x8xf32>, vector<16x8xf32>, vector<8x16xf32> -> vector<8x16xf32>
      %152 = arith.addf %151, %115 : vector<8x16xf32>
      %cst_87 = arith.constant dense<0xFF800000> : vector<8xf32>
      %153 = vector.multi_reduction <maximumf>, %152, %cst_87 [1] : vector<8x16xf32> to vector<8xf32>
      %154 = vector.shape_cast %153 : vector<8xf32> to vector<8x1xf32>
      %155 = vector.broadcast %154 : vector<8x1xf32> to vector<8x16xf32>
      %156 = arith.subf %152, %155 : vector<8x16xf32>
      %157 = math.exp %156 : vector<8x16xf32>
      %cst_88 = arith.constant dense<0.000000e+00> : vector<8xf32>
      %158 = vector.multi_reduction <add>, %157, %cst_88 [1] : vector<8x16xf32> to vector<8xf32>
      %159 = vector.shape_cast %158 : vector<8xf32> to vector<8x1xf32>
      %160 = tpu.reciprocal %159 : vector<8x1xf32> -> vector<8x1xf32>
      %161 = vector.broadcast %160 : vector<8x1xf32> to vector<8x16xf32>
      %162 = arith.mulf %157, %161 : vector<8x16xf32>
      %cst_89 = arith.constant dense<0.000000e+00> : vector<8x8xf32>
      %163 = tpu.matmul %162, %149, %cst_89 {dimension_numbers = #tpu.dot_dimension_numbers<[1], [0], [0], [1], [0, 0, 1, 1], [], []>} : vector<8x16xf32>, vector<16x8xf32>, vector<8x8xf32> -> vector<8x8xf32>
      %c0_90 = arith.constant 0 : index
      %c16_91 = arith.constant 16 : index
      %164 = vector.load %arg18[%c0_90, %c16_91] : memref<8x32xf32, #tpu.memory_space<vmem>>, vector<8x8xf32>
      tpu.vector_store %arg18[%c0_90, %c16_91], %163 {strides = array<i32>} : memref<8x32xf32, #tpu.memory_space<vmem>>, vector<8x8xf32>,
      %c0_92 = arith.constant 0 : index
      %c24_93 = arith.constant 24 : index
      %165 = vector.load %arg16[%c0_92, %c24_93] : memref<8x32xf32, #tpu.memory_space<vmem>>, vector<8x8xf32>
      %cst_94 = arith.constant dense<0.000000e+00> : vector<8x16xf32>
      %166 = tpu.matmul %165, %148, %cst_94 {dimension_numbers = #tpu.dot_dimension_numbers<[1], [1], [0], [0], [0, 0, 1, 0], [], []>} : vector<8x8xf32>, vector<16x8xf32>, vector<8x16xf32> -> vector<8x16xf32>
      %167 = arith.addf %166, %115 : vector<8x16xf32>
      %cst_95 = arith.constant dense<0xFF800000> : vector<8xf32>
      %168 = vector.multi_reduction <maximumf>, %167, %cst_95 [1] : vector<8x16xf32> to vector<8xf32>
      %169 = vector.shape_cast %168 : vector<8xf32> to vector<8x1xf32>
      %170 = vector.broadcast %169 : vector<8x1xf32> to vector<8x16xf32>
      %171 = arith.subf %167, %170 : vector<8x16xf32>
      %172 = math.exp %171 : vector<8x16xf32>
      %cst_96 = arith.constant dense<0.000000e+00> : vector<8xf32>
      %173 = vector.multi_reduction <add>, %172, %cst_96 [1] : vector<8x16xf32> to vector<8xf32>
      %174 = vector.shape_cast %173 : vector<8xf32> to vector<8x1xf32>
      %175 = tpu.reciprocal %174 : vector<8x1xf32> -> vector<8x1xf32>
      %176 = vector.broadcast %175 : vector<8x1xf32> to vector<8x16xf32>
      %177 = arith.mulf %172, %176 : vector<8x16xf32>
      %cst_97 = arith.constant dense<0.000000e+00> : vector<8x8xf32>
      %178 = tpu.matmul %177, %149, %cst_97 {dimension_numbers = #tpu.dot_dimension_numbers<[1], [0], [0], [1], [0, 0, 1, 1], [], []>} : vector<8x16xf32>, vector<16x8xf32>, vector<8x8xf32> -> vector<8x8xf32>
      %c0_98 = arith.constant 0 : index
      %c24_99 = arith.constant 24 : index
      %179 = vector.load %arg18[%c0_98, %c24_99] : memref<8x32xf32, #tpu.memory_space<vmem>>, vector<8x8xf32>
      tpu.vector_store %arg18[%c0_98, %c24_99], %178 {strides = array<i32>} : memref<8x32xf32, #tpu.memory_space<vmem>>, vector<8x8xf32>,
      %c0_100 = arith.constant 0 : index
      %c0_101 = arith.constant 0 : index
      %180 = vector.load %arg18[%c0_100, %c0_101] : memref<8x32xf32, #tpu.memory_space<vmem>>, vector<8x32xf32>
      %c0_102 = arith.constant 0 : index
      %c0_103 = arith.constant 0 : index
      %181 = vector.load %arg11[%c0_102, %c0_103] : memref<32x32xf32, #tpu.memory_space<vmem>>, vector<32x32xf32>
      %cst_104 = arith.constant dense<0.000000e+00> : vector<8x32xf32>
      %182 = tpu.matmul %180, %181, %cst_104 {dimension_numbers = #tpu.dot_dimension_numbers<[1], [0], [0], [1], [0, 0, 1, 1], [], []>} : vector<8x32xf32>, vector<32x32xf32>, vector<8x32xf32> -> vector<8x32xf32>
      %cst_105 = arith.constant 1.000000e+00 : f32
      %183 = vector.broadcast %cst_105 : f32 to vector<8x32xf32>
      %184 = arith.mulf %182, %183 : vector<8x32xf32>
      %185 = arith.addf %30, %184 : vector<8x32xf32>
      %c0_106 = arith.constant 0 : index
      %c0_107 = arith.constant 0 : index
      %186 = vector.load %arg19[%c0_106, %c0_107] : memref<8x32xf32, #tpu.memory_space<vmem>>, vector<8x32xf32>
      tpu.vector_store %arg19[%c0_106, %c0_107], %185 {strides = array<i32>} : memref<8x32xf32, #tpu.memory_space<vmem>>, vector<8x32xf32>,
      %c0_108 = arith.constant 0 : index
      %c0_109 = arith.constant 0 : index
      %187 = vector.load %arg7[%c0_108, %c0_109] : memref<1x32xf32, #tpu.memory_space<vmem>>, vector<1x32xf32>
      %188 = arith.mulf %185, %185 : vector<8x32xf32>
      %cst_110 = arith.constant dense<0.000000e+00> : vector<8xf32>
      %189 = vector.multi_reduction <add>, %188, %cst_110 [1] : vector<8x32xf32> to vector<8xf32>
      %190 = vector.shape_cast %189 : vector<8xf32> to vector<8x1xf32>
      %cst_111 = arith.constant 3.200000e+01 : f32
      %191 = vector.broadcast %cst_111 : f32 to vector<8x1xf32>
      %192 = arith.divf %190, %191 : vector<8x1xf32>
      %cst_112 = arith.constant 9.99999974E-6 : f32
      %193 = vector.broadcast %cst_112 : f32 to vector<8x1xf32>
      %194 = arith.addf %192, %193 : vector<8x1xf32>
      %195 = math.rsqrt %194 : vector<8x1xf32>
      %196 = vector.broadcast %195 : vector<8x1xf32> to vector<8x32xf32>
      %197 = arith.mulf %185, %196 : vector<8x32xf32>
      %198 = vector.broadcast %187 : vector<1x32xf32> to vector<8x32xf32>
      %199 = arith.mulf %197, %198 : vector<8x32xf32>
      %c0_113 = arith.constant 0 : index
      %c0_114 = arith.constant 0 : index
      %200 = vector.load %arg20[%c0_113, %c0_114] : memref<8x32xf32, #tpu.memory_space<vmem>>, vector<8x32xf32>
      tpu.vector_store %arg20[%c0_113, %c0_114], %199 {strides = array<i32>} : memref<8x32xf32, #tpu.memory_space<vmem>>, vector<8x32xf32>,
      %cst_115 = arith.constant 0.000000e+00 : f32
      %201 = vector.broadcast %cst_115 : f32 to vector<8x32xf32>
      %c0_116 = arith.constant 0 : index
      %c0_117 = arith.constant 0 : index
      %202 = vector.load %arg21[%c0_116, %c0_117] : memref<8x32xf32, #tpu.memory_space<vmem>>, vector<8x32xf32>
      tpu.vector_store %arg21[%c0_116, %c0_117], %201 {strides = array<i32>} : memref<8x32xf32, #tpu.memory_space<vmem>>, vector<8x32xf32>,
    } else {
    }
    %c0 = arith.constant 0 : index
    %c0_1 = arith.constant 0 : index
    %5 = vector.load %arg20[%c0, %c0_1] : memref<8x32xf32, #tpu.memory_space<vmem>>, vector<8x32xf32>
    %c0_2 = arith.constant 0 : index
    %c0_3 = arith.constant 0 : index
    %6 = vector.load %arg12[%c0_2, %c0_3] : memref<32x128xf32, #tpu.memory_space<vmem>>, vector<32x128xf32>
    %cst = arith.constant dense<0.000000e+00> : vector<8x128xf32>
    %7 = tpu.matmul %5, %6, %cst {dimension_numbers = #tpu.dot_dimension_numbers<[1], [0], [0], [1], [0, 0, 1, 1], [], []>} : vector<8x32xf32>, vector<32x128xf32>, vector<8x128xf32> -> vector<8x128xf32>
    %c0_4 = arith.constant 0 : index
    %c0_5 = arith.constant 0 : index
    %8 = vector.load %arg14[%c0_4, %c0_5] : memref<32x128xf32, #tpu.memory_space<vmem>>, vector<32x128xf32>
    %cst_6 = arith.constant dense<0.000000e+00> : vector<8x128xf32>
    %9 = tpu.matmul %5, %8, %cst_6 {dimension_numbers = #tpu.dot_dimension_numbers<[1], [0], [0], [1], [0, 0, 1, 1], [], []>} : vector<8x32xf32>, vector<32x128xf32>, vector<8x128xf32> -> vector<8x128xf32>
    %cst_7 = arith.constant 0.000000e+00 : f32
    %10 = vector.broadcast %cst_7 : f32 to vector<8x128xf32>
    %11 = arith.subf %10, %7 : vector<8x128xf32>
    %12 = math.exp %11 : vector<8x128xf32>
    %cst_8 = arith.constant 1.000000e+00 : f32
    %13 = vector.broadcast %cst_8 : f32 to vector<8x128xf32>
    %14 = arith.addf %13, %12 : vector<8x128xf32>
    %15 = tpu.reciprocal %14 : vector<8x128xf32> -> vector<8x128xf32>
    %16 = arith.mulf %7, %15 : vector<8x128xf32>
    %c0_9 = arith.constant 0 : index
    %c0_10 = arith.constant 0 : index
    %17 = vector.load %arg21[%c0_9, %c0_10] : memref<8x32xf32, #tpu.memory_space<vmem>>, vector<8x32xf32>
    %18 = arith.mulf %16, %9 : vector<8x128xf32>
    %c0_11 = arith.constant 0 : index
    %c0_12 = arith.constant 0 : index
    %19 = vector.load %arg13[%c0_11, %c0_12] : memref<128x32xf32, #tpu.memory_space<vmem>>, vector<128x32xf32>
    %cst_13 = arith.constant dense<0.000000e+00> : vector<8x32xf32>
    %20 = tpu.matmul %18, %19, %cst_13 {dimension_numbers = #tpu.dot_dimension_numbers<[1], [0], [0], [1], [0, 0, 1, 1], [], []>} : vector<8x128xf32>, vector<128x32xf32>, vector<8x32xf32> -> vector<8x32xf32>
    %21 = arith.addf %17, %20 : vector<8x32xf32>
    %c0_14 = arith.constant 0 : index
    %c0_15 = arith.constant 0 : index
    %22 = vector.load %arg21[%c0_14, %c0_15] : memref<8x32xf32, #tpu.memory_space<vmem>>, vector<8x32xf32>
    tpu.vector_store %arg21[%c0_14, %c0_15], %21 {strides = array<i32>} : memref<8x32xf32, #tpu.memory_space<vmem>>, vector<8x32xf32>,
    %c1_i32 = arith.constant 1 : i32
    %23 = arith.cmpi eq, %arg2, %c1_i32 : i32
    %24 = arith.extui %23 : i1 to i32
    %c0_i32_16 = arith.constant 0 : i32
    %25 = arith.cmpi ne, %24, %c0_i32_16 : i32
    scf.if %25 {
      %c0_17 = arith.constant 0 : index
      %c0_18 = arith.constant 0 : index
      %26 = vector.load %arg19[%c0_17, %c0_18] : memref<8x32xf32, #tpu.memory_space<vmem>>, vector<8x32xf32>
      %c0_19 = arith.constant 0 : index
      %c0_20 = arith.constant 0 : index
      %27 = vector.load %arg21[%c0_19, %c0_20] : memref<8x32xf32, #tpu.memory_space<vmem>>, vector<8x32xf32>
      %cst_21 = arith.constant 1.000000e+00 : f32
      %28 = vector.broadcast %cst_21 : f32 to vector<8x32xf32>
      %29 = arith.mulf %27, %28 : vector<8x32xf32>
      %30 = arith.addf %26, %29 : vector<8x32xf32>
      %c0_22 = arith.constant 0 : index
      %c0_23 = arith.constant 0 : index
      %c0_24 = arith.constant 0 : index
      %31 = vector.load %arg15[%c0_22, %c0_23, %c0_24] : memref<1x8x32xf32, #tpu.memory_space<vmem>>, vector<1x8x32xf32>
      %32 = vector.shape_cast %31 : vector<1x8x32xf32> to vector<8x32xf32>
      %33 = vector.shape_cast %30 : vector<8x32xf32> to vector<1x8x32xf32>
      tpu.vector_store %arg15[%c0_22, %c0_23, %c0_24], %33 {strides = array<i32>} : memref<1x8x32xf32, #tpu.memory_space<vmem>>, vector<1x8x32xf32>,
    } else {
    }
    return
  }
  func.func @transform_0(%arg0: i32, %arg1: i32, %arg2: i32) -> (i32, i32, i32) {
    %c0_i32 = arith.constant 0 : i32
    %c0_i32_0 = arith.constant 0 : i32
    %c0_i32_1 = arith.constant 0 : i32
    return %arg0, %c0_i32, %c0_i32_0 : i32, i32, i32
  }
  func.func @transform_1(%arg0: i32, %arg1: i32, %arg2: i32) -> (i32, i32) {
    %c0_i32 = arith.constant 0 : i32
    %c0_i32_0 = arith.constant 0 : i32
    %c0_i32_1 = arith.constant 0 : i32
    return %c0_i32, %c0_i32_0 : i32, i32
  }
  func.func @transform_2(%arg0: i32, %arg1: i32, %arg2: i32) -> (i32, i32) {
    %c0_i32 = arith.constant 0 : i32
    %c0_i32_0 = arith.constant 0 : i32
    %c0_i32_1 = arith.constant 0 : i32
    return %c0_i32, %c0_i32_0 : i32, i32
  }
  func.func @transform_3(%arg0: i32, %arg1: i32, %arg2: i32) -> (i32, i32) {
    %c0_i32 = arith.constant 0 : i32
    %c0_i32_0 = arith.constant 0 : i32
    %c0_i32_1 = arith.constant 0 : i32
    return %c0_i32, %c0_i32_0 : i32, i32
  }
  func.func @transform_4(%arg0: i32, %arg1: i32, %arg2: i32) -> (i32, i32) {
    %c0_i32 = arith.constant 0 : i32
    %c0_i32_0 = arith.constant 0 : i32
    %c0_i32_1 = arith.constant 0 : i32
    return %c0_i32, %c0_i32_0 : i32, i32
  }
  func.func @transform_5(%arg0: i32, %arg1: i32, %arg2: i32) -> (i32, i32) {
    %c0_i32 = arith.constant 0 : i32
    %c0_i32_0 = arith.constant 0 : i32
    %c0_i32_1 = arith.constant 0 : i32
    return %c0_i32, %c0_i32_0 : i32, i32
  }
  func.func @transform_6(%arg0: i32, %arg1: i32, %arg2: i32) -> (i32, i32) {
    %c0_i32 = arith.constant 0 : i32
    %c0_i32_0 = arith.constant 0 : i32
    %c0_i32_1 = arith.constant 0 : i32
    return %c0_i32, %c0_i32_0 : i32, i32
  }
  func.func @transform_7(%arg0: i32, %arg1: i32, %arg2: i32) -> (i32, i32) {
    %c0_i32 = arith.constant 0 : i32
    %c0_i32_0 = arith.constant 0 : i32
    %c0_i32_1 = arith.constant 0 : i32
    return %c0_i32, %c0_i32_0 : i32, i32
  }
  func.func @transform_8(%arg0: i32, %arg1: i32, %arg2: i32) -> (i32, i32) {
    %c0_i32 = arith.constant 0 : i32
    %c0_i32_0 = arith.constant 0 : i32
    %c0_i32_1 = arith.constant 0 : i32
    return %c0_i32, %c0_i32_0 : i32, i32
  }
  func.func @transform_9(%arg0: i32, %arg1: i32, %arg2: i32) -> (i32, i32) {
    %c0_i32 = arith.constant 0 : i32
    %c0_i32_0 = arith.constant 0 : i32
    return %c0_i32, %arg2 : i32, i32
  }
  func.func @transform_10(%arg0: i32, %arg1: i32, %arg2: i32) -> (i32, i32) {
    %c0_i32 = arith.constant 0 : i32
    %c0_i32_0 = arith.constant 0 : i32
    return %arg2, %c0_i32 : i32, i32
  }
  func.func @transform_11(%arg0: i32, %arg1: i32, %arg2: i32) -> (i32, i32) {
    %c0_i32 = arith.constant 0 : i32
    %c0_i32_0 = arith.constant 0 : i32
    return %c0_i32, %arg2 : i32, i32
  }
  func.func @transform_12(%arg0: i32, %arg1: i32, %arg2: i32) -> (i32, i32, i32) {
    %c0_i32 = arith.constant 0 : i32
    %c0_i32_0 = arith.constant 0 : i32
    return %arg0, %arg1, %c0_i32 : i32, i32, i32
  }
}

</mosaic_0001>

<bundles_post_ra>
// kernel: tpu_custom_call.1
= control target key start
LH: loop header
LB: loop body
LE: loop exit
PB: predicated region body
PF: predicated region fallthrough
CT: control target
= control target key end

     0   :  { %s3438_s0 = inlined_call_operand.vmem [shape: f32[2,16,32], index: 0, kind: input, shape index: {}]   ;;  %s3439_s1 = inlined_call_operand.vmem [shape: f32[16,16], index: 1, kind: input, shape index: {}]   ;;  %s3440_s2 = inlined_call_operand.vmem [shape: f32[16,16], index: 2, kind: input, shape index: {}]   ;;  %s3441_s3 = inlined_call_operand.vmem [shape: f32[1,32], index: 3, kind: input, shape index: {}]   ;;  %s3442_s4 = inlined_call_operand.vmem [shape: f32[1,32], index: 4, kind: input, shape index: {}]   ;;  %s3443_s5 = inlined_call_operand.vmem [shape: f32[32,32], index: 5, kind: input, shape index: {}]   ;;  %s3444_s6 = inlined_call_operand.vmem [shape: f32[32,16], index: 6, kind: input, shape index: {}]   ;;  %s3445_s7 = inlined_call_operand.vmem [shape: f32[32,16], index: 7, kind: input, shape index: {}]   ;;  %s3446_s8 = inlined_call_operand.vmem [shape: f32[32,32], index: 8, kind: input, shape index: {}]   ;;  %s3447_s9 = inlined_call_operand.vmem [shape: f32[32,256], index: 9, kind: input, shape index: {}]   ;;  %s3448_s10 = inlined_call_operand.vmem [shape: f32[256,32], index: 10, kind: input, shape index: {}]   ;;  %s3449_s11 = inlined_call_operand.vmem [shape: f32[32,256], index: 11, kind: input, shape index: {}]   ;;  %s3450_s12 = inlined_call_operand.hbm [shape: f32[2,16,32], index: 12, kind: output, shape index: {}]  }
   0x1   :  { %3463 = sst [smem:[#allocation21_spill]] %s3438_s0 }
   0x2   :  { %3464 = sst [smem:[#allocation22_spill]] %s3439_s1 }
   0x3   :  { %3465 = sst [smem:[#allocation23_spill]] %s3440_s2 }
   0x4   :  { %3466 = sst [smem:[#allocation24_spill]] %s3441_s3 }
   0x5   :  { %3467 = sst [smem:[#allocation25_spill]] %s3442_s4 }
   0x6   :  { %3468 = sst [smem:[#allocation26_spill]] %s3446_s8 }
   0x7   :  { %3469 = sst [smem:[#allocation27_spill]] %s3447_s9 }
   0x8   :  { %3470 = sst [smem:[#allocation28_spill]] %s3449_s11 }
   0x9   :  { %3471 = sst [smem:[#allocation29_spill]] %s3450_s12 }
   0xa   :  { %17 = vsyncpa [#allocation11], 0 }
   0xb   :  { %19 = vsyncpa [#allocation11 + $0x1], 0  ;;  %s2947_s21 = smov 0   ;;  %s2949_s22 = smov 0  }
   0xc   :  { %s2951_s23 = smov 0   ;;  %s2953_s24 = smov 0  }
   0xd   :  { %s2955_s25 = smov 0   ;;  %s2957_s26 = smov 0  }
   0xe   :  { %s2959_s27 = smov 0   ;;  %s2961_s28 = smov 0  }
   0xf   :  { %s2963_s29 = smov 0   ;;  %s2965_s30 = smov 0  }
  0x10   :  { %s2967_s13 = smov 0   ;;  %s2969_s14 = smov 0  }
  0x11 LB: > { %3472 = sst [smem:[#allocation13_spill]] %s2834_s25  ;;  %s2205_s15 = sadd.s32 4294967295, %s2862_s14   ;;  %s2862_s14 = sphi %s2969_s14, %s25_s14   ;;  %s2858_s13 = sphi %s2967_s13, %s3505_s13   ;;  %s2854_s30 = sphi %s2965_s30, %s3504_s30   ;;  %s2850_s29 = sphi %s2963_s29, %s3503_s29   ;;  %s2846_s28 = sphi %s2961_s28, %s3502_s28   ;;  %s2842_s27 = sphi %s2959_s27, %s3501_s27   ;;  %s2838_s26 = sphi %s2957_s26, %s3500_s26   ;;  %s2834_s25 = sphi %s2955_s25, %s3499_s25   ;;  %s2830_s24 = sphi %s2953_s24, %s3498_s24   ;;  %s2826_s23 = sphi %s2951_s23, %s3508_s23   ;;  %s2822_s22 = sphi %s2949_s22, %s3507_s22   ;;  %s2818_s21 = sphi %s2947_s21, %s3506_s21  }
  0x12   : > { %3473 = sst [smem:[#allocation14_spill]] %s2850_s29  ;;  %s2206_s16 = sadd.s32 4294967294, %s2862_s14  }
  0x13   : > { %3474 = sst [smem:[#allocation15_spill]] %s2854_s30  ;;  %s37_s17 = sadd.s32 1, %s2850_s29 }
  0x14   : > { %3475 = sst [smem:[#allocation16_spill]] %s2858_s13  ;;  %p38_p0 = scmp.ge.s32.totalorder %s37_s17, 2 }
  0x15   : > { %s40_s18 = sadd.s32 1, %s2854_s30  ;;  %s44_s19 = sadd.s32 1, %s2858_s13 }
  0x16   : > { %p252_p1 = scmp.ne.s32.totalorder %s2834_s25, %s2830_s24  ;;  %s3510_s17 = smov (%p38_p0, %s37_s17), 0 }
  0x17   : > { %3476 = sst [smem:[#allocation17_spill]] %s3510_s17  ;;  %s3512_s18 = smov (!%p38_p0, %s40_s18), %s2854_s30 }
  0x18   : > { %s242_s20 = ssub.s32 %s2850_s29, %s3510_s17  ;;  %p253_p2 = scmp.eq.s32.totalorder %s2862_s14, 0 }
  0x19   : > { %p42_p3 = scmp.ge.s32.totalorder %s3512_s18, 2  ;;  %p243_p4 = scmp.eq.s32.totalorder %s242_s20, 0 }
  0x1a   : > { %s245_s12 = sadd.s32 1, %s2834_s25  ;;  %p3021_p5 = por %p253_p2, %p252_p1 }
  0x1b   : > { %s3514_s18 = smov (%p42_p3, %s3512_s18), 0  ;;  %s3516_s19 = smov (!%p42_p3, %s44_s19), %s2858_s13 }
  0x1c   : > { %3478 = sst [smem:[#allocation18_spill]] %s3514_s18  ;;  %p46_p6 = scmp.ge.s32.totalorder %s3516_s19, 2 }
  0x1d   : > { %s3029_s8 = scalar_select %p243_p4, %s2834_s25, %s245_s12  }
  0x1e   : > { %s321_s3 = ssub.s32 %s2854_s30, %s3514_s18  ;;  %p335_p7 = scmp.ne.s32.totalorder %s2826_s23, %s2822_s22 }
  0x1f   : > { %3479 = sst [smem:[#allocation19_spill]] %s3029_s8  ;;  %p336_p8 = scmp.eq.s32.totalorder %s2205_s15, 7 }
  0x20   : > { %s3518_s19 = smov (%p46_p6, %s3516_s19), 0  ;;  %p341_p10 = scmp.ne.s32.totalorder %s2822_s22, %s2818_s21 }
  0x21   : > { %3480 = sst [smem:[#allocation20_spill]] %s3518_s19  ;;  %p3037_p9 = por %p336_p8, %p335_p7 }
  0x22   : > { %s320_s17 = ssub.s32 %s2858_s13, %s3518_s19  ;;  %p342_p11 = scmp.eq.s32.totalorder %s2206_s16, 7 }
  0x23   : > { %s322_s1 = sor.u32 %s321_s3, %s320_s17  ;;  %s325_s2 = sadd.s32 1, %s2826_s23 }
  0x24   : > { %p323_p12 = scmp.eq.s32.totalorder %s322_s1, 0  ;;  %p3046_p13 = por %p342_p11, %p341_p10 }
  0x25   : > { %p2208_p0 = scmp.ge.s32.totalorder %s2862_s14, 8 }
  0x26   : > { %s3051_s18 = scalar_select %p323_p12, %s2826_s23, %s325_s2  }
  0x27   : > { %382 = sbr.rel (%p2208_p0) target bundleno = 70 (0x46), region = 48 }
  0x2e   : > { %393 = sbr.rel (!%p3021_p5) target bundleno = 58 (0x3a), region = 56  ;;  %s395_s15 = sand.u32 (%p3021_p5), 1, %s2834_s25  }
  0x2f   : > { %s2210_s19 = sshll.u32 (%p3021_p5), %s2850_s29, 3  ;;  %s2209_s16 = sshll.u32 (%p3021_p5), %s395_s15, 5 }
  0x30   : > { %s3483_s9 = sld [smem:[#allocation27_spill]] (%p3021_p5)  ;;  %s397_s2 = scalar_lea.vmem (%p3021_p5), [#allocation8], %s2209_s16 }
  0x36   : > { %s399_s1 = scalar_lea.vmem %s3483_s9, %s2210_s19 }
  0x37   : > { %v433_v0 = vld [vmem:[%s399_s1] sm:$0xff]  ;;  %v435_v1 = vld [vmem:[%s399_s1 + $0x10] sm:$0xff] }
  0x38   : > { %v437_v2 = vld [vmem:[%s399_s1 + $0x20] sm:$0xff]  ;;  %434 = vst [vmem:[%s397_s2] sm:$0xff] %v433_v0  ;;  %436 = vst [vmem:[%s397_s2 + $0x8] sm:$0xff] %v435_v1  ;;  %v439_v3 = vld [vmem:[%s399_s1 + $0x30] sm:$0xff] }
  0x39   : > { %438 = vst [vmem:[%s397_s2 + $0x10] sm:$0xff] %v437_v2  ;;  %440 = vst [vmem:[%s397_s2 + $0x18] sm:$0xff] %v439_v3 }
  0x3a PF: > { %455 = sbr.rel (!%p3021_p5) target bundleno = 70 (0x46), region = 98  ;;  %s457_s15 = sand.u32 (%p3021_p5), 1, %s2834_s25  }
  0x3b   : > { %s2212_s13 = sshll.u32 (%p3021_p5), %s2850_s29, 3  ;;  %s2211_s30 = sshll.u32 (%p3021_p5), %s457_s15, 5 }
  0x3c   : > { %s3484_s11 = sld [smem:[#allocation28_spill]] (%p3021_p5)  ;;  %s459_s16 = scalar_lea.vmem (%p3021_p5), [#allocation9], %s2211_s30 }
  0x42   : > { %s461_s17 = scalar_lea.vmem %s3484_s11, %s2212_s13 }
  0x43   : > { %v495_v4 = vld [vmem:[%s461_s17] sm:$0xff]  ;;  %v497_v5 = vld [vmem:[%s461_s17 + $0x10] sm:$0xff] }
  0x44   : > { %v499_v6 = vld [vmem:[%s461_s17 + $0x20] sm:$0xff]  ;;  %496 = vst [vmem:[%s459_s16] sm:$0xff] %v495_v4  ;;  %498 = vst [vmem:[%s459_s16 + $0x8] sm:$0xff] %v497_v5  ;;  %v501_v7 = vld [vmem:[%s461_s17 + $0x30] sm:$0xff] }
  0x45   : > { %500 = vst [vmem:[%s459_s16 + $0x10] sm:$0xff] %v499_v6  ;;  %502 = vst [vmem:[%s459_s16 + $0x18] sm:$0xff] %v501_v7 }
  0x46 PF: > { %p2213_p1 = scmp.ge.s32.totalorder %s2862_s14, 1  ;;  %p507_p2 = scmp.lt.s32.totalorder %s2862_s14, 9 }
  0x48   : > { %p508_p3 = pnand %p2213_p1, %p507_p2 }
  0x49   : > { %s514_s4 = sand.u32 (!%p508_p3), 1, %s2830_s24   ;;  %s3461_s30 = sand.u32 (!%p508_p3), 1, %s2822_s22  }
  0x4a   : > { %511 = sbr.rel (%p508_p3) target bundleno = 4094 (0xffe), region = 136  ;;  %s2214_s13 = sshll.u32 (!%p508_p3), %s514_s4, 5 }
  0x4b   : > { %s3074_s1 = sshll.u32 (!%p508_p3), %s3461_s30, 3  ;;  %p576_p4 = scmp.lt.s32.totalorder (!%p508_p3), %s2846_s28, 1 }
  0x4c   : > { %s2219_s2 = sshll.u32 (!%p508_p3), %s2838_s26, 4  ;;  %s3079_s15 = sshll.u32 (!%p508_p3), %s2842_s27, 3 }
  0x4d   : > { %p582_p5 = scmp.lt.s32.totalorder (!%p508_p3), %s2219_s2, 31  ;;  %s3485_s0 = sld [smem:[#allocation21_spill]] (!%p508_p3) }
  0x4e   : > { %s3090_s30 = scalar_lea.vmem (!%p508_p3), [#allocation8], %s2214_s13  ;;  %s3092_s8 = scalar_lea.vmem (!%p508_p3), [#allocation9], %s2214_s13 }
  0x4f   : > { %p2222_p6 = scmp.ne.s32.totalorder (!%p508_p3), %s2838_s26, 0 }
  0x51   : > { %s577_s3 = scalar_select %p576_p4, %s2846_s28, 1 }
  0x52   : > { %s3520_s2 = smov (!%p582_p5, %s2219_s2), 31  ;;  %591 = sbr.rel (%p2222_p6) target bundleno = 3587 (0xe03), region = 148 }
  0x53   : > { %s2255_s19 = sshll.u32 %s577_s3, 4  ;;  %s2220_s11 = sshll.u32 %s3520_s2, 3  ;;  %vm599_vm0 = vcmask (!%p2222_p6), 261120   ;;  %v632_v17 = vld [vmem:[%s3443_s5] sm:$0xff] (!%p2222_p6)  ;;  %v633_v18 = vld [vmem:[%s3443_s5 + $0x8] sm:$0xff] (!%p2222_p6)  ;;  %v2864_v20 = vmov (!%p2222_p6), 0.0|0.0  }
  0x54   : > { %s580_s9 = scalar_lea.vmem %s3485_s0, %s2255_s19  ;;  %s3088_s4 = scalar_lea.vmem %s3448_s10, %s2220_s11  ;;  %v709_v19 = vld [vmem:[%s3444_s6] sm:$0xff] (!%p2222_p6)  ;;  %2486 = vmatprep.subr.bf16.mxu0 (!%p2222_p6), %v2864_v20  ;;  %v2487_v21 = vpack.c.bf16 (!%p2222_p6), %v633_v18, %v632_v17  ;;  %v710_v22 = vld [vmem:[%s3444_s6 + $0x8] sm:$0xff] (!%p2222_p6)  ;;  %v634_v23 = vld [vmem:[%s3443_s5 + $0x10] sm:$0xff] (!%p2222_p6)  ;;  %vm2865_vm1 = vmmov (!%p2222_p6), 0   ;;  %v2866_v25 = vmov (!%p2222_p6), 0.0   ;;  %vm947_vm2 = vcmask (!%p2222_p6), 31744  }
  0x55   : > { %v3096_v8 = vld [vmem:[%s580_s9] sm:$0xff] (!%p2222_p6)  ;;  %s594_s3 = scalar_lea.vmem (!%p2222_p6), %s580_s9, %s3079_s15  ;;  %v3099_v9 = vld [vmem:[%s580_s9 + $0x8] sm:$0xff] (!%p2222_p6)  ;;  %v635_v24 = vld [vmem:[%s3443_s5 + $0x18] sm:$0xff] (!%p2222_p6)  ;;  %2337 = vmatprep.mubr.msk.f32.mxu0 (!%p2222_p6), %vm2865_vm1, %v2866_v25  ;;  %1799 = vst.msk [vmem:[#allocation7] sm:$0xff] (!%p2222_p6), %vm599_vm0, %v2866_v25  ;;  %v2492_v26 = vpack.c.bf16 (!%p2222_p6), %v710_v22, %v709_v19  ;;  %s3486_s29 = sld [smem:[#allocation23_spill]] (!%p2222_p6)  ;;  %vm953_vm3 = vcmask (!%p2222_p6), 64544  }
  0x56   : > { %v597_v10 = vmul.f32 (!%p2222_p6), %v3096_v8, %v3096_v8  ;;  %v3103_v11 = vld [vmem:[%s594_s3] sm:$0xff] (!%p2222_p6)  ;;  %v598_v12 = vmul.f32 (!%p2222_p6), %v3099_v9, %v3099_v9  ;;  %v711_v27 = vld [vmem:[%s3444_s6 + $0x10] sm:$0xff] (!%p2222_p6)  ;;  %v712_v28 = vld [vmem:[%s3444_s6 + $0x18] sm:$0xff] (!%p2222_p6)  ;;  %2488 = vmatpush3.bf16.msra.mxu0 (!%p2222_p6), %v2487_v21  ;;  %v2490_v29 = vpack.c.bf16 (!%p2222_p6), %v635_v24, %v634_v23  ;;  %s2867_s0 = smov (!%p2222_p6), 8   ;;  %s2868_s24 = smov (!%p2222_p6), 16   ;;  %vm959_vm4 = vcmask (!%p2222_p6), 97344  }
  0x57   : > { %v623_v13 = vmul.f32 (!%p2222_p6), %v3103_v11, %v3103_v11  ;;  %v2496_v30 = vpack.c.bf16 (!%p2222_p6), %v712_v28, %v711_v27  ;;  %2489 = vmatprep.subr.bf16.mxu0 (!%p2222_p6), %v2864_v20  ;;  %2493 = vmatprep.subr.bf16.mxu1 (!%p2222_p6), %v2492_v26  ;;  %v794_v31 = vld [vmem:[%s3445_s7] sm:$0xff] (!%p2222_p6)  ;;  %v795_v32 = vld [vmem:[%s3445_s7 + $0x8] sm:$0xff] (!%p2222_p6)  ;;  %s3488_s11 = sld [smem:[#allocation22_spill]] (!%p2222_p6)  ;;  %s3489_s17 = sld [smem:[#allocation24_spill]] (!%p2222_p6)  ;;  %v796_v52 = vld [vmem:[%s3445_s7 + $0x10] sm:$0xff] (!%p2222_p6)  ;;  %vm964_vm5 = vcmask (!%p2222_p6), 130144  }
  0x58   : > { %v600_v14 = vsel (!%p2222_p6), %vm599_vm0, %v597_v10, 0.0  ;;  %v603_v16 = vsel (!%p2222_p6), %vm599_vm0, %v598_v12, 0.0  ;;  %2495 = vmatpush3.bf16.msra.mxu1 (!%p2222_p6), %v2492_v26  ;;  %v2500_v33 = vpack.c.bf16 (!%p2222_p6), %v795_v32, %v794_v31  ;;  %v797_v53 = vld [vmem:[%s3445_s7 + $0x18] sm:$0xff] (!%p2222_p6)  ;;  %s2870_s16 = smov (!%p2222_p6), 112   ;;  %s2871_s3 = smov (!%p2222_p6), 124   ;;  %vm969_vm6 = vcmask (!%p2222_p6), 162944  }
  0x59   : > { %601 = vadd.xlane.f32.xlu0 %v600_v14  ;;  %v624_v15 = vsel %vm599_vm0, %v623_v13, 0.0  ;;  %2497 = vmatprep.subr.bf16.mxu1 %v2496_v30  ;;  %v2504_v58 = vpack.c.bf16 %v797_v53, %v796_v52  ;;  %s2872_s9 = smov 4   ;;  %s2874_s13 = smov 12   ;;  %vm974_vm7 = vcmask 195744   ;;  %vm1018_vm8 = vcmask 64512  }
  0x5a   : > { %625 = vadd.xlane.f32.xlu1 %v624_v15  ;;  %2491 = vmatpush3.bf16.msra.mxu0 %v2490_v29  ;;  %vm979_vm9 = vcmask 228544   ;;  %vm981_vm10 = vcmask 261344   ;;  %vm3242_vm11 = vmpackc.low %vm1018_vm8, %vm1018_vm8  ;;  %vm1098_vm13 = vcmask 130048   ;;  %vm1348_vm14 = vcmask 130112  }
  0x5b   : > { %2501 = vmatprep.subr.bf16.mxu0 %v2500_v33  ;;  %s3487_s2 = smov %s3486_s29  ;;  %v879_v34 = vld [vmem:[%s3486_s29] sm:$0xff]  ;;  %s2873_s29 = smov 116   ;;  %vm1534_vm15 = vcmask 195712  }
  0x5c   : > { %2499 = vmatpush3.bf16.msra.mxu1 %v2496_v30  ;;  %s875_s25 = scalar_lea.vmem %s3487_s2, %s3079_s15  ;;  %v880_v35 = vld [vmem:[%s3487_s2 + $0x8] sm:$0xff] }
  0x5d   : > { %604 = vadd.xlane.f32.xlu0 %v603_v16  ;;  %2508 = vmatprep.subr.bf16.mxu1 %v2864_v20  ;;  %v3160_v36 = vld [vmem:[%s875_s25] sm:$0xff]  ;;  %v3175_v38 = vld [vmem:[%s3488_s11 + $0x8] sm:$0xff]  ;;  %s873_s19 = scalar_lea.vmem %s3488_s11, %s3079_s15  ;;  %s3493_s25 = sld [smem:[#allocation25_spill]] }
  0x5e   : > { %v3168_v37 = vld [vmem:[%s3488_s11] sm:$0xff] }
  0x5f   : > { %v2223_v49 = vld [vmem:[%s3489_s17] ss:$0 sm:$0xff]  ;;  %s2869_s17 = smov 120  }
  0x60   : > { %v874_v61 = vld [vmem:[%s873_s19] sm:$0xff]  ;;  %s3492_s19 = sld [smem:[#allocation26_spill]] }
  0x6b   : > { %907 = vrot.lane.b32.xlu1 %v879_v34, %s2867_s0 }
  0x6f   : > { %883 = vrot.lane.b32.xlu1 %v3160_v36, %s2868_s24 }
  0x73   : > { %909 = vrot.lane.b32.xlu0 %v880_v35, %s2867_s0  ;;  %927 = vrot.lane.b32.xlu1 %v3168_v37, %s2867_s0 }
  0x77   : > { %929 = vrot.lane.b32.xlu1 %v3175_v38, %s2867_s0 }
  0xe6   : > { %v602_v39 = vpop.xlane.xlu0 %601 }
  0xe7   : > { %v607_v40 = vmul.f32 0.03125, %v602_v39  ;;  %v626_v41 = vpop.xlane.xlu1 %625 }
  0xe8   : > { %v627_v42 = vmul.f32 0.03125, %v626_v41 }
  0xe9   : > { %v609_v43 = vadd.f32 1e-05, %v607_v40 }
  0xea   : > { %v628_v44 = vadd.f32 1e-05, %v627_v42  ;;  %v605_v45 = vpop.xlane.xlu0 %604 }
  0xeb   : > { %2708 = vrsqrt.f32 %v609_v43  ;;  %v608_v46 = vmul.f32 0.03125, %v605_v45  ;;  %v908_v6 = vpop.permute.xlu1 %907 }
  0xec   : > { %2710 = vrsqrt.f32 %v628_v44 }
  0xed   : > { %v610_v47 = vadd.f32 1e-05, %v608_v46 }
  0xee   : > { %v910_v4 = vpop.permute.xlu0 %909 }
  0xef   : > { %2712 = vrsqrt.f32 %v610_v47  ;;  %v884_v15 = vpop.permute.xlu1 %883 }
  0xf3   : > { %v928_v17 = vpop.permute.xlu1 %927 }
  0xf5   : > { %v2709_v48 = vpop.eup %2708 }
  0xf6   : > { %v2711_v50 = vpop.eup %2710  ;;  %v613_v51 = vmul.f32 %v2709_v48, %v3096_v8 }
  0xf7   : > { %v630_v54 = vmul.f32 %v2711_v50, %v3103_v11  ;;  %v930_v18 = vpop.permute.xlu1 %929 }
  0xf8   : > { %v621_v55 = vmul.f32 %v2223_v49, %v613_v51 }
  0xf9   : > { %v2713_v56 = vpop.eup %2712  ;;  %v631_v57 = vmul.f32 %v2223_v49, %v630_v54 }
  0xfa   : > { %v614_v59 = vmul.f32 %v2713_v56, %v3099_v9  ;;  %2348 = vmatprep.mubr.msk.f32.mxu1 %vm599_vm0, %v621_v55 }
  0xfb   : > { %2338 = vmatmul.mubr.msk.f32.vlgmr.msra.gmra.mrb[0].mxu0 %vm599_vm0, %v631_v57  ;;  %v1009_v57 = vstv %s3079_s15  ;;  %s2876_s15 = smov 104  }
  0xfc   : > { %v622_v60 = vmul.f32 %v2223_v49, %v614_v59  ;;  %2503 = vmatpush3.bf16.msra.mxu0 %v2500_v33  ;;  %2359 = vmatprep.mubr.msk.f32.mxu0 %vm599_vm0, %v621_v55  ;;  %v1007_v55 = vlaneseq }
  0xfd   : > { %2505 = vmatprep.subr.bf16.mxu0 %v2504_v58 }
  0xfe   : > { %2349 = vmatmul.mubr.msk.f32.vlgmr.msra.gmra.mrb[0].mxu1 %vm599_vm0, %v622_v60  ;;  %v1008_v56 = vshrl.u32 %v1007_v55, 7  ;;  %v1012_v59 = vand.u32 127, %v1007_v55 }
  0xff   : > { %2366 = vmatprep.mubr.msk.f32.mxu1 %vm2865_vm1, %v2866_v25 }
 0x100   : > { %2507 = vmatpush3.bf16.msra.mxu0 %v2504_v58  ;;  %v1010_v58 = vadd.s32 %v1009_v57, %v1008_v56 }
 0x101   : > { %2519 = vmatprep.subr.bf16.mxu0 %v2864_v20 }
 0x102   : > { %vm1013_vm12 = vcmp.ge.s32.totalorder %v1010_v58, %v1012_v59 }
 0x103   : > { %2360 = vmatmul.mubr.msk.f32.vlgmr.msra.gmra.mrb[2].mxu0 %vm599_vm0, %v622_v60  ;;  %v2875_v60 = vmov -1e+30  }
 0x104   : > { %2387 = vmatprep.mubr.msk.f32.mxu0 %vm2865_vm1, %v2866_v25 }
 0x1ce   : > { %v705_v62 = vpop.f32.mrb[0].mxu0 }
 0x1cf   : > { %v2339_v63 = vpop.f32.mrb[1].mxu0  ;;  %v881_v0 = vmul.f32 %v874_v61, %v705_v62  ;;  %v897_v14 = vmul.f32 %v3160_v36, %v705_v62  ;;  %v886_v16 = vmul.f32 %v884_v15, %v705_v62 }
 0x1d1   : > { %v2350_v1 = vpop.f32.mrb[0].mxu1 }
 0x1d2   : > { %v785_v2 = vpop.f32.mrb[1].mxu1  ;;  %v936_v3 = vmul.f32 %v2350_v1, %v880_v35  ;;  %v914_v7 = vmul.f32 %v2350_v1, %v910_v4  ;;  %v934_v19 = vmul.f32 %v2350_v1, %v930_v18  ;;  %v904_v24 = vmul.f32 %v2350_v1, %v3175_v38 }
 0x1d3   : > { %v935_v5 = vmul.f32 %v879_v34, %v785_v2  ;;  %v913_v10 = vmul.f32 %v908_v6, %v785_v2  ;;  %v903_v27 = vmul.f32 %v3168_v37, %v785_v2  ;;  %v933_v36 = vmul.f32 %v928_v17, %v785_v2 }
 0x1d4   : > { %941 = vrot.lane.b32.xlu1 %v936_v3, %s2867_s0 }
 0x1d5   : > { %939 = vrot.lane.b32.xlu0 %v935_v5, %s2867_s0 }
 0x1d6   : > { %v3207_v8 = vpop.f32.mrb[2].mxu0 }
 0x1d7   : > { %v3209_v9 = vpop.f32.mrb[3].mxu0 }
 0x1d8   : > { %v2703_v12 = vpack.i.bf16 %v3207_v8, %v3209_v9  ;;  %v3215_v13 = vpack.c.bf16 %v3207_v8, %v3209_v9  ;;  %919 = vrot.lane.b32.xlu1 %v914_v7, %s2869_s17 }
 0x1d9   : > { %917 = vrot.lane.b32.xlu0 %v913_v10, %s2869_s17 }
 0x1da   : > { %2521 = vmatpush3.bf16.msra.mxu0 %v3215_v13 }
 0x1db   : > { %2522 = vmatprep.subr.bf16.mxu0 %v2864_v20 }
 0x1dc   : > { %899 = vrot.lane.b32.xlu1 %v897_v14, %s2868_s24 }
 0x1dd   : > { %893 = vrot.lane.b32.xlu0 %v874_v61, %s2868_s24  ;;  %v3260_v61 = vsel %vm1013_vm12, 0.0, %v2875_v60 }
 0x1e1   : > { %888 = vrot.lane.b32.xlu0 %v886_v16, %s2870_s16 }
 0x246   : > { %v942_v21 = vpop.permute.xlu1 %941 }
 0x247   : > { %v946_v22 = vadd.f32 %v942_v21, %v934_v19  ;;  %v940_v23 = vpop.permute.xlu0 %939 }
 0x248   : > { %v945_v39 = vadd.f32 %v940_v23, %v933_v36 }
 0x249   : > { %989 = vrot.lane.b32.xlu0 %v946_v22, %s2871_s3 }
 0x24a   : > { %v920_v26 = vpop.permute.xlu1 %919 }
 0x24b   : > { %v924_v28 = vsub.f32 %v904_v24, %v920_v26  ;;  %v918_v29 = vpop.permute.xlu0 %917 }
 0x24c   : > { %v923_v30 = vsub.f32 %v903_v27, %v918_v29 }
 0x24d   : > { %984 = vst.msk [vmem:[#allocation3 + $0x8] sm:$0xff] %vm947_vm2, %v924_v28  ;;  %999 = vrot.lane.b32.xlu0 %v924_v28, %s2872_s9 }
 0x24e   : > { %983 = vst.msk [vmem:[#allocation3] sm:$0xff] %vm947_vm2, %v923_v30  ;;  %v900_v32 = vpop.permute.xlu1 %899 }
 0x24f   : > { %v894_v31 = vpop.permute.xlu0 %893 }
 0x250   : > { %v896_v33 = vmul.f32 %v894_v31, %v705_v62 }
 0x252   : > { %v902_v34 = vadd.f32 %v900_v32, %v896_v33 }
 0x253   : > { %v889_v35 = vpop.permute.xlu0 %888 }
 0x254   : > { %v891_v38 = vsub.f32 %v881_v0, %v889_v35  ;;  %950 = vrot.lane.b32.xlu1 %v902_v34, %s2873_s29 }
 0x256   : > { %948 = vst.msk [vmem:[#allocation2] sm:$0xff] %vm947_vm2, %v891_v38  ;;  %956 = vrot.lane.b32.xlu0 %v891_v38, %s2872_s9 }
 0x258   : > { %987 = vrot.lane.b32.xlu1 %v945_v39, %s2871_s3 }
 0x25a   : > { %966 = vrot.lane.b32.xlu0 %v891_v38, %s2867_s0 }
 0x25c   : > { %997 = vrot.lane.b32.xlu1 %v923_v30, %s2872_s9 }
 0x25e   : > { %976 = vrot.lane.b32.xlu0 %v891_v38, %s2874_s13  ;;  %s2877_s13 = smov 24  }
 0x260   : > { %961 = vrot.lane.b32.xlu1 %v902_v34, %s2869_s17 }
 0x264   : > { %971 = vrot.lane.b32.xlu1 %v902_v34, %s2871_s3 }
 0x2bb   : > { %v990_v37 = vpop.permute.xlu0 %989 }
 0x2bc   : > { %994 = vst.msk [vmem:[#allocation3 + $0x8] sm:$0xff] %vm953_vm3, %v990_v37 }
 0x2bf   : > { %v1000_v40 = vpop.permute.xlu0 %999 }
 0x2c0   : > { %1004 = vst.msk [vmem:[#allocation3 + $0x8] sm:$0xff] %vm959_vm4, %v1000_v40 }
 0x2c1   : > { %1006 = vst.msk [vmem:[#allocation3 + $0x8] sm:$0xff] %vm964_vm5, %v946_v22 }
 0x2c6   : > { %v951_v41 = vpop.permute.xlu1 %950 }
 0x2c7   : > { %954 = vst.msk [vmem:[#allocation2] sm:$0xff] %vm953_vm3, %v951_v41 }
 0x2c8   : > { %v957_v42 = vpop.permute.xlu0 %956  ;;  %v1016_v50 = vld [vmem:[#allocation3 + $0x8] sm:$0xff] }
 0x2c9   : > { %960 = vst.msk [vmem:[#allocation2] sm:$0xff] %vm959_vm4, %v957_v42 }
 0x2ca   : > { %v988_v43 = vpop.permute.xlu1 %987 }
 0x2cb   : > { %993 = vst.msk [vmem:[#allocation3] sm:$0xff] %vm953_vm3, %v988_v43 }
 0x2cc   : > { %v967_v45 = vpop.permute.xlu0 %966 }
 0x2ce   : > { %v998_v44 = vpop.permute.xlu1 %997 }
 0x2cf   : > { %1003 = vst.msk [vmem:[#allocation3] sm:$0xff] %vm959_vm4, %v998_v44 }
 0x2d0   : > { %1005 = vst.msk [vmem:[#allocation3] sm:$0xff] %vm964_vm5, %v945_v39  ;;  %v977_v48 = vpop.permute.xlu0 %976 }
 0x2d2   : > { %v962_v46 = vpop.permute.xlu1 %961 }
 0x2d3   : > { %965 = vst.msk [vmem:[#allocation2] sm:$0xff] %vm964_vm5, %v962_v46 }
 0x2d4   : > { %970 = vst.msk [vmem:[#allocation2] sm:$0xff] %vm969_vm6, %v967_v45 }
 0x2d6   : > { %v972_v47 = vpop.permute.xlu1 %971 }
 0x2d7   : > { %975 = vst.msk [vmem:[#allocation2] sm:$0xff] %vm974_vm7, %v972_v47  ;;  %v3238_v49 = vld [vmem:[#allocation3] sm:$0xff] }
 0x2d8   : > { %980 = vst.msk [vmem:[#allocation2] sm:$0xff] %vm979_vm9, %v977_v48  ;;  %v2509_v52 = vpack.c.bf16 %v1016_v50, %v3238_v49  ;;  %v2698_v53 = vpack.i.bf16 %v1016_v50, %v3238_v49 }
 0x2d9   : > { %982 = vst.msk [vmem:[#allocation2] sm:$0xff] %vm981_vm10, %v902_v34 }
 0x2da   : > { %2511 = vmatpush3.bf16.xpose.msk.msra.mxu1 %vm3242_vm11, %v2509_v52 }
 0x2db   : > { %2512 = vmatprep.subr.bf16.mxu1 %v2864_v20 }
 0x2e0   : > { %v3251_v54 = vld [vmem:[#allocation2] sm:$0xff] }
 0x2e1   : > { %2367 = vmatmul.mubr.msk.f32.vlgmr.msra.gmra.mrb[2].mxu1 %vm1018_vm8, %v3251_v54 }
 0x2e2   : > { %2514 = vmatpush3.bf16.msra.mxu1 %v3215_v13  ;;  %2373 = vmatprep.mubr.msk.f32.mxu1 %vm2865_vm1, %v2866_v25 }
 0x2e3   : > { %2515 = vmatprep.subr.bf16.mxu1 %v2864_v20 }
 0x3b4   : > { %v1094_v62 = vpop.f32.mrb[2].mxu1 }
 0x3b5   : > { %v1095_v63 = vadd.f32 %v1094_v62, %v3260_v61  ;;  %v2368_v0 = vpop.f32.mrb[3].mxu1 }
 0x3b7   : > { %v1099_v1 = vsel %vm1098_vm13, %v1095_v63, -inf }
 0x3b8   : > { %1100 = vmax.xlane.f32.xlu1 %v1099_v1 }
 0x445   : > { %v1101_v2 = vpop.xlane.xlu1 %1100 }
 0x446   : > { %v1102_v3 = vsub.f32 %v1095_v63, %v1101_v2 }
 0x448   : > { %v1103_v4 = vmul.f32 1.442695, %v1102_v3 }
 0x44a   : > { %2714 = vpow2.f32 %v1103_v4  ;;  %v1703_v4 = vld [vmem:[%s3492_s19] sm:$0xff] }
 0x454   : > { %v2715_v5 = vpop.eup %2714 }
 0x455   : > { %v1105_v6 = vsel %vm1098_vm13, %v2715_v5, 0.0 }
 0x456   : > { %1106 = vadd.xlane.f32.xlu0 %v1105_v6 }
 0x46c   : > { %1186 = vrot.lane.b32.xlu0 %v3251_v54, %s2869_s17 }
 0x470   : > { %1354 = vrot.lane.b32.xlu0 %v3251_v54, %s2870_s16 }
 0x4e3   : > { %v1107_v7 = vpop.xlane.xlu0 %1106 }
 0x4e4   : > { %2716 = vrcp.f32 %v1107_v7  ;;  %v1705_v7 = vld [vmem:[%s3492_s19 + $0x10] sm:$0xff] }
 0x4e7   : > { %v1187_v14 = vpop.permute.xlu0 %1186 }
 0x4eb   : > { %v1355_v35 = vpop.permute.xlu0 %1354 }
 0x4ee   : > { %v2717_v10 = vpop.eup %2716 }
 0x4ef   : > { %v1109_v13 = vmul.f32 %v2717_v10, %v2715_v5  ;;  %v1704_v5 = vld [vmem:[%s3492_s19 + $0x8] sm:$0xff]  ;;  %v1706_v10 = vld [vmem:[%s3492_s19 + $0x18] sm:$0xff] }
 0x4f0   : > { %v2537_v6 = vpack.c.bf16 %v1704_v5, %v1703_v4 }
 0x4f1   : > { %2374 = vmatmul.mubr.msk.f32.vlgmr.msra.gmra.mrb[4].mxu1 %vm1098_vm13, %v1109_v13  ;;  %v2540_v13 = vpack.c.bf16 %v1706_v10, %v1705_v7 }
 0x4f2   : > { %2518 = vmatpush3.bf16.xpose.msk.msra.mxu1 %vm3242_vm11, %v2509_v52  ;;  %2380 = vmatprep.mubr.msk.f32.mxu1 %vm2865_vm1, %v2866_v25 }
 0x4f3   : > { %2526 = vmatprep.subr.bf16.mxu1 %v2864_v20 }
 0x4f9   : > { %2381 = vmatmul.mubr.msk.f32.vlgmr.msra.gmra.mrb[6].mxu1 %vm1018_vm8, %v1187_v14 }
 0x4fa   : > { %2401 = vmatprep.mubr.msk.f32.mxu1 %vm2865_vm1, %v2866_v25 }
 0x5c4   : > { %v1179_v15 = vpop.f32.mrb[4].mxu1 }
 0x5c5   : > { %1183 = vst.msk [vmem:[#allocation4] sm:$0xff] %vm1018_vm8, %v1179_v15  ;;  %v2375_v16 = vpop.f32.mrb[5].mxu1 }
 0x5cc   : > { %v1256_v17 = vpop.f32.mrb[6].mxu1 }
 0x5cd   : > { %v1257_v18 = vadd.f32 %v1256_v17, %v3260_v61  ;;  %v2382_v19 = vpop.f32.mrb[7].mxu1 }
 0x5cf   : > { %v1260_v21 = vsel %vm1098_vm13, %v1257_v18, -inf }
 0x5d0   : > { %1261 = vmax.xlane.f32.xlu1 %v1260_v21 }
 0x65d   : > { %v1262_v22 = vpop.xlane.xlu1 %1261 }
 0x65e   : > { %v1263_v23 = vsub.f32 %v1257_v18, %v1262_v22 }
 0x660   : > { %v1264_v24 = vmul.f32 1.442695, %v1263_v23 }
 0x662   : > { %2718 = vpow2.f32 %v1264_v24 }
 0x66c   : > { %v2719_v26 = vpop.eup %2718 }
 0x66d   : > { %v1266_v27 = vsel %vm1098_vm13, %v2719_v26, 0.0 }
 0x66e   : > { %1267 = vadd.xlane.f32.xlu1 %v1266_v27  ;;  %v2246_v27 = vld [vmem:[%s3493_s25] ss:$0 sm:$0xff] }
 0x67f   : > { %2699 = vrot.lane.b32.xlu1 %v2698_v53, %s2869_s17 }
 0x6fb   : > { %v1268_v28 = vpop.xlane.xlu1 %1267 }
 0x6fc   : > { %2720 = vrcp.f32 %v1268_v28 }
 0x6ff   : > { %v2700_v29 = vpop.permute.xlu1 %2699 }
 0x700   : > { %v2702_v30 = vunpack.i.h.bf16 %v2700_v29  ;;  %v2701_v31 = vunpack.i.l.bf16 %v2700_v29 }
 0x702   : > { %v2523_v34 = vpack.c.bf16 %v2702_v30, %v2701_v31 }
 0x706   : > { %v2721_v32 = vpop.eup %2720 }
 0x707   : > { %v1270_v33 = vmul.f32 %v2721_v32, %v2719_v26 }
 0x709   : > { %2388 = vmatmul.mubr.msk.f32.vlgmr.msra.gmra.mrb[4].mxu0 %vm1098_vm13, %v1270_v33 }
 0x70a   : > { %2525 = vmatpush3.bf16.xpose.msk.msra.mxu0 %vm3242_vm11, %v2523_v34  ;;  %2394 = vmatprep.mubr.msk.f32.mxu0 %vm2865_vm1, %v2866_v25 }
 0x70b   : > { %2533 = vmatprep.subr.bf16.mxu0 %v2864_v20 }
 0x711   : > { %2395 = vmatmul.mubr.msk.f32.vlgmr.msra.gmra.mrb[6].mxu0 %vm1018_vm8, %v1355_v35 }
 0x712   : > { %2415 = vmatprep.mubr.msk.f32.mxu0 %vm2865_vm1, %v2866_v25 }
 0x7dc   : > { %v1340_v36 = vpop.f32.mrb[4].mxu0 }
 0x7dd   : > { %v2389_v38 = vpop.f32.mrb[5].mxu0 }
 0x7e4   : > { %v1434_v39 = vpop.f32.mrb[6].mxu0 }
 0x7e5   : > { %v1435_v37 = vadd.f32 %v1434_v39, %v3260_v61  ;;  %v2396_v40 = vpop.f32.mrb[7].mxu0 }
 0x7e7   : > { %v1438_v41 = vsel %vm1098_vm13, %v1435_v37, -inf }
 0x7e8   : > { %1439 = vmax.xlane.f32.xlu0 %v1438_v41 }
 0x7fe   : > { %2704 = vrot.lane.b32.xlu0 %v2703_v12, %s2869_s17 }
 0x875   : > { %v1440_v42 = vpop.xlane.xlu0 %1439 }
 0x876   : > { %v1441_v43 = vsub.f32 %v1435_v37, %v1440_v42 }
 0x878   : > { %v1442_v44 = vmul.f32 1.442695, %v1441_v43 }
 0x879   : > { %v2705_v45 = vpop.permute.xlu0 %2704 }
 0x87a   : > { %2722 = vpow2.f32 %v1442_v44  ;;  %v2707_v46 = vunpack.i.h.bf16 %v2705_v45  ;;  %v2706_v47 = vunpack.i.l.bf16 %v2705_v45 }
 0x87c   : > { %v2527_v48 = vpack.c.bf16 %v2707_v46, %v2706_v47 }
 0x87e   : > { %2528 = vmatpush3.bf16.msra.mxu1 %v2527_v48  ;;  %2535 = vmatpush3.bf16.msra.mxu0 %v2527_v48 }
 0x87f   : > { %2529 = vmatprep.subr.bf16.mxu1 %v2864_v20  ;;  %2536 = vmatprep.subr.bf16.mxu0 %v2864_v20 }
 0x884   : > { %v2723_v49 = vpop.eup %2722 }
 0x885   : > { %v1444_v50 = vsel %vm1098_vm13, %v2723_v49, 0.0 }
 0x886   : > { %1445 = vadd.xlane.f32.xlu1 %v1444_v50 }
 0x897   : > { %1538 = vrot.lane.b32.xlu1 %v3251_v54, %s2876_s15 }
 0x913   : > { %v1446_v8 = vpop.xlane.xlu1 %1445 }
 0x914   : > { %2724 = vrcp.f32 %v1446_v8 }
 0x917   : > { %v1539_v52 = vpop.permute.xlu1 %1538 }
 0x91e   : > { %v2725_v9 = vpop.eup %2724 }
 0x91f   : > { %v1448_v12 = vmul.f32 %v2725_v9, %v2723_v49 }
 0x921   : > { %2402 = vmatmul.mubr.msk.f32.vlgmr.msra.gmra.mrb[8].mxu1 %vm1098_vm13, %v1448_v12 }
 0x922   : > { %2532 = vmatpush3.bf16.xpose.msk.msra.mxu1 %vm3242_vm11, %v2523_v34  ;;  %2408 = vmatprep.mubr.msk.f32.mxu1 %vm2865_vm1, %v2866_v25 }
 0x929   : > { %2409 = vmatmul.mubr.msk.f32.vlgmr.msra.gmra.mrb[10].mxu1 %vm1018_vm8, %v1539_v52 }
 0x9f4   : > { %v1526_v53 = vpop.f32.mrb[8].mxu1 }
 0x9f5   : > { %v2403_v55 = vpop.f32.mrb[9].mxu1 }
 0x9fc   : > { %v1608_v56 = vpop.f32.mrb[10].mxu1 }
 0x9fd   : > { %v1609_v54 = vadd.f32 %v1608_v56, %v3260_v61  ;;  %v2410_v57 = vpop.f32.mrb[11].mxu1 }
 0x9ff   : > { %v1612_v58 = vsel %vm1098_vm13, %v1609_v54, -inf }
 0xa00   : > { %1613 = vmax.xlane.f32.xlu0 %v1612_v58 }
 0xa16   : > { %1345 = vrot.lane.b32.xlu0 %v1340_v36, %s2867_s0 }
 0xa8d   : > { %v1614_v59 = vpop.xlane.xlu0 %1613 }
 0xa8e   : > { %v1615_v51 = vsub.f32 %v1609_v54, %v1614_v59 }
 0xa90   : > { %v1616_v60 = vmul.f32 1.442695, %v1615_v51 }
 0xa91   : > { %v1346_v62 = vpop.permute.xlu0 %1345 }
 0xa92   : > { %2726 = vpow2.f32 %v1616_v60  ;;  %1349 = vst.msk [vmem:[#allocation4] sm:$0xff] %vm1348_vm14, %v1346_v62 }
 0xa9c   : > { %v2727_v63 = vpop.eup %2726 }
 0xa9d   : > { %v1618_v0 = vsel %vm1098_vm13, %v2727_v63, 0.0 }
 0xa9e   : > { %1619 = vadd.xlane.f32.xlu1 %v1618_v0 }
 0xaaf   : > { %1531 = vrot.lane.b32.xlu1 %v1526_v53, %s2868_s24 }
 0xb2b   : > { %v1620_v61 = vpop.xlane.xlu1 %1619 }
 0xb2c   : > { %2728 = vrcp.f32 %v1620_v61 }
 0xb2f   : > { %v1532_v1 = vpop.permute.xlu1 %1531 }
 0xb30   : > { %1535 = vst.msk [vmem:[#allocation4] sm:$0xff] %vm1534_vm15, %v1532_v1 }
 0xb36   : > { %v2729_v2 = vpop.eup %2728 }
 0xb37   : > { %v1622_v3 = vmul.f32 %v2729_v2, %v2727_v63 }
 0xb39   : > { %2416 = vmatmul.mubr.msk.f32.vlgmr.msra.gmra.mrb[8].mxu0 %vm1098_vm13, %v1622_v3 }
 0xb3a   : > { %2426 = vmatprep.mubr.msk.f32.mxu0 %vm2865_vm1, %v2866_v25  ;;  %2538 = vmatpush3.bf16.msra.mxu0 %v2537_v6  ;;  %vm1700_vm1 = vcmask 261312  }
 0xb3b   : > { %2539 = vmatprep.subr.bf16.mxu0 %v2864_v20 }
 0xb3e   : > { %2541 = vmatpush3.bf16.msra.mxu0 %v2540_v13 }
 0xc0c   : > { %v1692_v25 = vpop.f32.mrb[8].mxu0 }
 0xc0d   : > { %1697 = vrot.lane.b32.xlu0 %v1692_v25, %s2877_s13  ;;  %v2417_v14 = vpop.f32.mrb[9].mxu0 }
 0xc7f   : > { %v1698_v15 = vpop.permute.xlu0 %1697 }
 0xc80   : > { %1701 = vst.msk [vmem:[#allocation4] sm:$0xff] %vm1700_vm1, %v1698_v15 }
 0xc87   : > { %v1702_v16 = vld [vmem:[#allocation4] sm:$0xff] }
 0xc88   : > { %2427 = vmatmul.mubr.msk.f32.vlgmr.msra.gmra.mrb[10].mxu0 %vm599_vm0, %v1702_v16 }
 0xd5b   : > { %v1776_v17 = vpop.f32.mrb[10].mxu0 }
 0xd5c   : > { %v1780_v18 = vadd.f32 %v1776_v17, %v3103_v11  ;;  %v2428_v19 = vpop.f32.mrb[11].mxu0 }
 0xd5e   : > { %1781 = vst.msk [vmem:[#allocation5] sm:$0xff] %vm599_vm0, %v1780_v18  ;;  %v1783_v21 = vmul.f32 %v1780_v18, %v1780_v18 }
 0xd60   : > { %v1784_v20 = vsel %vm599_vm0, %v1783_v21, 0.0 }
 0xd61   : > { %1785 = vadd.xlane.f32.xlu1 %v1784_v20 }
 0xdee   : > { %v1786_v22 = vpop.xlane.xlu1 %1785 }
 0xdef   : > { %v1787_v23 = vmul.f32 0.03125, %v1786_v22 }
 0xdf1   : > { %v1788_v24 = vadd.f32 1e-05, %v1787_v23 }
 0xdf3   : > { %2730 = vrsqrt.f32 %v1788_v24 }
 0xdfd   : > { %v2731_v26 = vpop.eup %2730 }
 0xdfe   : > { %v1790_v28 = vmul.f32 %v2731_v26, %v1780_v18 }
 0xe00   : > { %v1797_v29 = vmul.f32 %v2246_v27, %v1790_v28 }
 0xe02   : > { %1798 = vst.msk [vmem:[#allocation6] sm:$0xff] %vm599_vm0, %v1797_v29 }
 0xe03 PF: > { %v1801_v11 = vld [vmem:[%s3090_s30] sm:$0xff]  ;;  %v1802_v30 = vld [vmem:[%s3090_s30 + $0x8] sm:$0xff]  ;;  %v1803_v31 = vld [vmem:[%s3090_s30 + $0x10] sm:$0xff]  ;;  %v2878_v32 = vmov 0.0|0.0   ;;  %vm2879_vm2 = vmmov 0   ;;  %v2880_v35 = vmov 0.0  }
 0xe04   : > { %2542 = vmatprep.subr.bf16.mxu1 %v2878_v32  ;;  %v2543_v33 = vpack.c.bf16 %v1802_v30, %v1801_v11  ;;  %v1804_v34 = vld [vmem:[%s3090_s30 + $0x18] sm:$0xff]  ;;  %2437 = vmatprep.mubr.msk.f32.mxu1 %vm2879_vm2, %v2880_v35  ;;  %v1879_v38 = vld [vmem:[%s3092_s8] sm:$0xff]  ;;  %v1880_v39 = vld [vmem:[%s3092_s8 + $0x8] sm:$0xff]  ;;  %vm1805_vm0 = vcmask 261120   ;;  %p2249_p7 = scmp.ne.s32.totalorder %s2838_s26, 1 }
 0xe05   : > { %2554 = vmatprep.subr.bf16.mxu0 %v2878_v32  ;;  %2483 = vmatprep.mubr.msk.f32.mxu0 %vm2879_vm2, %v2880_v35  ;;  %v2546_v36 = vpack.c.bf16 %v1804_v34, %v1803_v31  ;;  %v2549_v40 = vpack.c.bf16 %v1880_v39, %v1879_v38  ;;  %v1881_v41 = vld [vmem:[%s3092_s8 + $0x10] sm:$0xff]  ;;  %v1882_v42 = vld [vmem:[%s3092_s8 + $0x18] sm:$0xff]  ;;  %v1961_v44 = vld [vmem:[%s3088_s4] sm:$0xff]  ;;  %s3494_s8 = scalar_lea.vmem (!%p2249_p7), [#allocation10], %s3074_s1 }
 0xe06   : > { %2544 = vmatpush3.bf16.msra.mxu1 %v2543_v33  ;;  %v2552_v43 = vpack.c.bf16 %v1882_v42, %v1881_v41  ;;  %v1962_v45 = vld [vmem:[%s3088_s4 + $0x8] sm:$0xff]  ;;  %v1963_v47 = vld [vmem:[%s3088_s4 + $0x10] sm:$0xff]  ;;  %v1964_v48 = vld [vmem:[%s3088_s4 + $0x18] sm:$0xff] }
 0xe07   : > { %2545 = vmatprep.subr.bf16.mxu1 %v2878_v32  ;;  %v2555_v46 = vpack.c.bf16 %v1962_v45, %v1961_v44  ;;  %v2558_v49 = vpack.c.bf16 %v1964_v48, %v1963_v47  ;;  %v1965_v50 = vld [vmem:[%s3088_s4 + $0x20] sm:$0xff]  ;;  %v1966_v8 = vld [vmem:[%s3088_s4 + $0x28] sm:$0xff]  ;;  %v1967_v12 = vld [vmem:[%s3088_s4 + $0x30] sm:$0xff] }
 0xe08   : > { %v2561_v9 = vpack.c.bf16 %v1966_v8, %v1965_v50  ;;  %v1968_v52 = vld [vmem:[%s3088_s4 + $0x38] sm:$0xff]  ;;  %v1969_v55 = vld [vmem:[%s3088_s4 + $0x40] sm:$0xff]  ;;  %v1970_v56 = vld [vmem:[%s3088_s4 + $0x48] sm:$0xff] }
 0xe09   : > { %v1800_v37 = vld [vmem:[#allocation6] sm:$0xff]  ;;  %2556 = vmatpush3.bf16.msra.mxu0 %v2555_v46  ;;  %v2564_v53 = vpack.c.bf16 %v1968_v52, %v1967_v12  ;;  %v2567_v54 = vpack.c.bf16 %v1970_v56, %v1969_v55  ;;  %v1971_v57 = vld [vmem:[%s3088_s4 + $0x50] sm:$0xff]  ;;  %v1972_v58 = vld [vmem:[%s3088_s4 + $0x58] sm:$0xff] }
 0xe0a   : > { %2547 = vmatpush3.bf16.msra.mxu1 %v2546_v36  ;;  %2557 = vmatprep.subr.bf16.mxu0 %v2878_v32  ;;  %v2570_v59 = vpack.c.bf16 %v1972_v58, %v1971_v57  ;;  %v1973_v51 = vld [vmem:[%s3088_s4 + $0x60] sm:$0xff]  ;;  %v1974_v60 = vld [vmem:[%s3088_s4 + $0x68] sm:$0xff]  ;;  %v1975_v63 = vld [vmem:[%s3088_s4 + $0x70] sm:$0xff] }
 0xe0b   : > { %2548 = vmatprep.subr.bf16.mxu1 %v2878_v32  ;;  %v2573_v62 = vpack.c.bf16 %v1974_v60, %v1973_v51  ;;  %v1976_v0 = vld [vmem:[%s3088_s4 + $0x78] sm:$0xff]  ;;  %v1959_v15 = vld [vmem:[#allocation7] sm:$0xff]  ;;  %v2053_v19 = vld [vmem:[#allocation5] sm:$0xff] (!%p2249_p7) }
 0xe0c   : > { %v2576_v61 = vpack.c.bf16 %v1976_v0, %v1975_v63 }
 0xe0d   : > { %2438 = vmatmul.mubr.msk.f32.vlgmr.msra.gmra.mrb[0].mxu1 %vm1805_vm0, %v1800_v37  ;;  %2559 = vmatpush3.bf16.msra.mxu0 %v2558_v49 }
 0xe0e   : > { %2550 = vmatpush3.bf16.msra.mxu1 %v2549_v40  ;;  %2448 = vmatprep.mubr.msk.f32.mxu1 %vm2879_vm2, %v2880_v35 }
 0xe0f   : > { %2551 = vmatprep.subr.bf16.mxu1 %v2878_v32  ;;  %2560 = vmatprep.subr.bf16.mxu0 %v2878_v32 }
 0xe11   : > { %2562 = vmatpush3.bf16.msra.mxu0 %v2561_v9 }
 0xe12   : > { %2553 = vmatpush3.bf16.msra.mxu1 %v2552_v43  ;;  %2563 = vmatprep.subr.bf16.mxu0 %v2878_v32 }
 0xe15   : > { %2449 = vmatmul.mubr.msk.f32.vlgmr.msra.gmra.mrb[2].mxu1 %vm1805_vm0, %v1800_v37  ;;  %2565 = vmatpush3.bf16.msra.mxu0 %v2564_v53 }
 0xe16   : > { %2566 = vmatprep.subr.bf16.mxu0 %v2878_v32 }
 0xe19   : > { %2568 = vmatpush3.bf16.msra.mxu0 %v2567_v54 }
 0xe1a   : > { %2569 = vmatprep.subr.bf16.mxu0 %v2878_v32 }
 0xe1d   : > { %2571 = vmatpush3.bf16.msra.mxu0 %v2570_v59 }
 0xe1e   : > { %2572 = vmatprep.subr.bf16.mxu0 %v2878_v32 }
 0xe21   : > { %2574 = vmatpush3.bf16.msra.mxu0 %v2573_v62 }
 0xe22   : > { %2575 = vmatprep.subr.bf16.mxu0 %v2878_v32 }
 0xe25   : > { %2577 = vmatpush3.bf16.msra.mxu0 %v2576_v61 }
 0xee0   : > { %v1875_v1 = vpop.f32.mrb[0].mxu1 }
 0xee1   : > { %v1953_v2 = vsub.f32 0.0, %v1875_v1  ;;  %v2439_v3 = vpop.f32.mrb[1].mxu1 }
 0xee3   : > { %v1954_v4 = vmul.f32 1.442695, %v1953_v2 }
 0xee5   : > { %2732 = vpow2.f32 %v1954_v4 }
 0xee8   : > { %v1949_v5 = vpop.f32.mrb[2].mxu1 }
 0xee9   : > { %v2450_v6 = vpop.f32.mrb[3].mxu1 }
 0xeef   : > { %v2733_v7 = vpop.eup %2732 }
 0xef0   : > { %v1956_v10 = vadd.f32 1.0, %v2733_v7 }
 0xef2   : > { %2734 = vrcp.f32 %v1956_v10 }
 0xefc   : > { %v2735_v13 = vpop.eup %2734 }
 0xefd   : > { %v1958_v25 = vmul.f32 %v2735_v13, %v1875_v1 }
 0xeff   : > { %v1960_v14 = vmul.f32 %v1958_v25, %v1949_v5 }
 0xf01   : > { %2484 = vmatmul.mubr.f32.vlgmr.msra.gmra.mrb[0].mxu0 %v1960_v14 }
 0xfd1   : > { %2052 = sbr.rel (%p2249_p7) target bundleno = 4066 (0xfe2), region = 152 }
 0xfd4   : > { %v2043_v16 = vpop.f32.mrb[0].mxu0 }
 0xfd5   : > { %v2047_v17 = vadd.f32 %v2043_v16, %v1959_v15  ;;  %v2485_v18 = vpop.f32.mrb[1].mxu0 }
 0xfd7   : > { %2048 = vst.msk [vmem:[#allocation7] sm:$0xff] %vm1805_vm0, %v2047_v17 }
 0xfde   : > { %v2054_v21 = vld [vmem:[#allocation7] sm:$0xff] }
 0xfdf   : > { %v2055_v20 = vadd.f32 %v2054_v21, %v2053_v19 }
 0xfe1   : > { %2056 = vst.msk [vmem:[%s3494_s8] sm:$0xff] %vm1805_vm0, %v2055_v20 }
 0xfe2 PF: > { %s2251_s30 = sshll.u32 %s2846_s28, 1  ;;  %s3495_s17 = scalar_lea.vmem [#allocation10], %s3074_s1 }
 0xfe3   : > { %s2069_s4 = sadd.s32 %s2842_s27, %s2251_s30  ;;  %s2073_s16 = sshll.u32 %s3495_s17, 4  ;;  %s3375_s16 = int_to_ptr.vmem [resolvable:$true] %s2073_s16 }
 0xfe4   : > { %s2252_s24 = sshll.u32 %s2069_s4, 7  ;;  %s3496_s9 = sld [smem:[#allocation29_spill]] }
 0xfe5   : > { %s3497_s13 = sand.u32 1, %s2822_s22   ;;  %s2736_s0 = scalar_lea.vmem %s3375_s16, 128 }
 0xfe6   : > { %s2058_s15 = scalar_lea.sflag [#allocation11], %s3497_s13  ;;  %p2737_p8 = scmp.ne.s32.totalorder %s3375_s16, %s2736_s0 }
 0xfe7   : > { %s2881_s27 = smov [#allocation10]  }
 0xfe8   : > { %p2738_p10 = pnand %p2737_p8, %p3037_p9  ;;  %s2740_s28 = sshll.u32 %s2881_s27, 4  ;;  %s2741_s28 = int_to_ptr.vmem [resolvable:$false] %s2740_s28 }
 0xfe9   : > { %s2742_s1 = scalar_lea.vmem %s2741_s28, 256  ;;  %p2743_p12 = scmp.lt.s32.totalorder %s3375_s16, %s2741_s28 }
 0xfea   : > { %s2071_s29 = scalar_lea.hbm %s3496_s9, %s2252_s24  ;;  %p2739_p11 = pneg %p2738_p10 }
 0xfeb   : > { %p2744_p0 = scmp.lt.s32.totalorder %s2742_s1, %s2736_s0 }
 0xfed   : > { %p2745_p1 = por %p2744_p0, %p2743_p12 }
 0xfef   : > { %p2746_p2 = pnand %p2745_p1, %p2739_p11 }
 0xff1   : > { %2749 = shalt.err (!%p2746_p2)
}
 0xff2   : > { %s2750_s25 = scalar_lea.hbm %s2071_s29, 128  ;;  %s2754_s4 = scalar_lea.hbm %s3496_s9, 512 }
 0xff3   : > { %p2751_p3 = scmp.ne.s32.totalorder %s2071_s29, %s2750_s25  ;;  %p2755_p6 = scmp.lt.u32.totalorder %s2071_s29, %s3496_s9 }
 0xff4   : > { %p2756_p7 = scmp.lt.u32.totalorder %s2754_s4, %s2750_s25  ;;  %p2758_p10 = scmp.lt.u32.totalorder %s2750_s25, %s2071_s29 }
 0xff5   : > { %p2752_p4 = pnand %p2751_p3, %p3037_p9 }
 0xff6   : > { %p2757_p8 = por %p2756_p7, %p2755_p6 }
 0xff7   : > { %p2753_p5 = pneg %p2752_p4 }
 0xff8   : > { %p2759_p12 = por %p2758_p10, %p2757_p8 }
 0xffa   : > { %p2760_p11 = pnand %p2759_p12, %p2753_p5 }
 0xffc   : > { %2763 = shalt.err (!%p2760_p11)
}
 0xffd   : > { %2578 = dma.vmem_to_hbm [thread:$0]  (%p3037_p9), %s3375_s16, 128, %s2071_s29, %s2058_s15  }
 0xffe PF: > { %p2584_p0 = scmp.ge.s32.totalorder %s2862_s14, 2  ;;  %s2085_s26 = sand.u32 1, %s2818_s21  }
 0xfff   : > { %s2086_s3 = scalar_lea.sflag [#allocation11], %s2085_s26 }
0x1000   : > { %p2581_p1 = pnand %p2584_p0, %p3046_p13 }
0x1002   : > { %2813 = dma.done.wait (!%p2581_p1), %s2086_s3, 128  }
0x1003   : > { %2815 = vsyncadd (!%p2581_p1), %s2086_s3, 4294967168  ;;  %s25_s14 = sadd.s32 1, %s2862_s14   ;;  %s3498_s24 = sld [smem:[#allocation13_spill]] }
0x1004   : > { %p22_p2 = scmp.ge.s32.totalorder %s25_s14, 10   ;;  %s3499_s25 = sld [smem:[#allocation19_spill]] }
0x1005   : > { %s3500_s26 = sld [smem:[#allocation14_spill]]  ;;  %s3501_s27 = sld [smem:[#allocation15_spill]] }
0x1006   : > { %s3502_s28 = sld [smem:[#allocation16_spill]]  ;;  %s3503_s29 = sld [smem:[#allocation17_spill]] }
0x1007   : > { %s3504_s30 = sld [smem:[#allocation18_spill]]  ;;  %s3505_s13 = sld [smem:[#allocation20_spill]] }
0x1008   : > { %s3506_s21 = smov %s2822_s22  ;;  %s3507_s22 = smov %s2826_s23 }
0x1009   : > { %s3508_s23 = smov %s3051_s18  ;;  %24 = sbr.rel (!%p22_p2) target bundleno = 17 (0x11), region = 209 }
0x1010   :  { %2091 = vsyncpa [#allocation11], 1 }
0x1011   :  { %2093 = vsyncpa [#allocation11 + $0x1], 1 }

</bundles_post_ra>
